<compile_context>
chip_gen: v6e
topology: v6e:2x2x1
jax: 0.10.0
libtpu: 0.0.40
codegen_flags: <defaults>
</compile_context>

<pallas_src>
import functools

import numpy as np
import jax
import jax.numpy as jnp
from jax import lax
from jax.experimental import pallas as pl
from jax.experimental.pallas import tpu as pltpu


_PACK = 2  # batch elements folded into the 128-lane axis per grid step


def _round_up(n, m):
    return (n + m - 1) // m * m


# ----------------------------------------------------------------------------
# Compile-time constants (numpy, built at trace time -> embedded constants).
# ----------------------------------------------------------------------------
def _build_shift_masks(V, T, pack):
    """S[tap, j, l] = 1 iff conv tap `tap` at output lane l reads source lane j.

    x_tap = x @ S[tap] gives the shifted, zero-edge-padded input for that 3x3
    tap, for all `pack` batch elements folded into the lane axis at once.
    """
    VT = V * T
    L = pack * VT
    l = np.arange(L)
    b = l // VT
    v = (l % VT) // T
    t = l % T
    S = np.zeros((9, L, L), np.float32)
    for kh in range(3):
        for kw in range(3):
            tap = kh * 3 + kw
            vv = v + kh - 1
            tt = t + kw - 1
            valid = (vv >= 0) & (vv < V) & (tt >= 0) & (tt < T)
            src = b * VT + np.clip(vv, 0, V - 1) * T + np.clip(tt, 0, T - 1)
            S[tap, src[valid], l[valid]] = 1.0
    return S


def _build_attn_bias(V, T, pack):
    """(L, L) additive bias: 0 within one (batch, v) block of T lanes, -1e30 off."""
    L = pack * V * T
    blk = np.arange(L) // T
    return np.where(blk[:, None] == blk[None, :], 0.0, -1e30).astype(np.float32)


# ----------------------------------------------------------------------------
# One-time weight preparation (call at parameter-load time, outside jit).
# ----------------------------------------------------------------------------
def _w_to_2d(w):
    # (Cout, Cin, 3, 3) -> (Cout, 9*Cin), tap-major columns (tap = kh*3 + kw).
    cout, cin = w.shape[0], w.shape[1]
    return jnp.transpose(w, (0, 2, 3, 1)).reshape(cout, 9 * cin)


def prepare_tattn_params(wq, wk, wv, wav):
    C8, C = wq.shape[0], wq.shape[1]
    C2 = wv.shape[0]
    assert C2 % 8 == 0, "in_channels must be a multiple of 16 for aligned tiles"
    qk_rows = max(8, _round_up(C8, 8))          # pad Q/K blocks to 8 sublanes
    pad_qk = lambda w2: jnp.pad(w2, ((0, qk_rows - w2.shape[0]), (0, 0)))
    wqkv2d = jnp.concatenate(
        [pad_qk(_w_to_2d(wq)), pad_qk(_w_to_2d(wk)), _w_to_2d(wv)], axis=0)
    wav2d = _w_to_2d(wav)                       # (C, 9*C2)
    return wqkv2d, wav2d, qk_rows


# ----------------------------------------------------------------------------
# Fused kernel: QKV conv + attention + attn_value conv + residual.
# One grid step = _PACK batch elements packed into the lane axis.
# ----------------------------------------------------------------------------
def _tattn_fused_kernel(x_ref, s_ref, bias_ref, wqkv_ref, wav_ref, sigma_ref,
                        o_ref, xstack, avstack, *, C, C2, qk_rows):
    x = x_ref[0].astype(jnp.float32)                              # (C, L)

    # 3x3 conv taps built in VMEM: xstack[tap*C + c, :] = shifted/masked x.
    for tap in range(9):
        xstack[tap * C:(tap + 1) * C, :] = jnp.dot(
            x, s_ref[tap], preferred_element_type=jnp.float32)

    # Fused Q/K/V conv: one (2*qk_rows + C2, 9C) x (9C, L) MXU matmul.
    qkv = jnp.dot(wqkv_ref[...], xstack[...],
                  preferred_element_type=jnp.float32)             # (QKP, L)
    tq = jnp.tanh(qkv[:qk_rows, :])              # zero-padded rows -> tanh(0)=0
    tk = jnp.tanh(qkv[qk_rows:2 * qk_rows, :])
    val = qkv[2 * qk_rows:2 * qk_rows + C2, :]

    # Scores for every (batch, v) block at once + precomputed block-diag bias.
    s = lax.dot_general(tq, tk, (((0,), (0,)), ((), ())),
                        preferred_element_type=jnp.float32)       # (L, L)
    s = s + bias_ref[...]
    s = s - jnp.max(s, axis=-1, keepdims=True)
    e = jnp.exp(s)
    denom = jnp.sum(e, axis=-1, keepdims=True)
    r = pl.reciprocal(denom, approx=True)
    r = r * (2.0 - denom * r)                    # one Newton step -> ~f32 exact
    p = e * r                                                      # (L, L)

    # av[c, i] = sum_j val[c, j] * p[i, j]   (masked j contribute exactly 0)
    av = lax.dot_general(val, p, (((1,), (1,)), ((), ())),
                         preferred_element_type=jnp.float32)       # (C2, L)

    # 3x3 attn_value conv with the same shift matrices, fused with residual.
    for tap in range(9):
        avstack[tap * C2:(tap + 1) * C2, :] = jnp.dot(
            av, s_ref[tap], preferred_element_type=jnp.float32)
    conv_out = jnp.dot(wav_ref[...], avstack[...],
                       preferred_element_type=jnp.float32)         # (C, L)

    o_ref[0] = (x + sigma_ref[0] * conv_out).astype(o_ref.dtype)


# ----------------------------------------------------------------------------
# Full tAttn forward (weights already prepared).
# ----------------------------------------------------------------------------
@jax.jit
def tattn_forward(x, wqkv2d, wav2d, sigma):
    B, C, V, T = x.shape
    C2 = wav2d.shape[1] // 9
    QKP = wqkv2d.shape[0]
    qk_rows = (QKP - C2) // 2
    VT = V * T
    L = _PACK * VT

    Bp = _round_up(B, _PACK)
    xw = x.astype(jnp.float32)
    if Bp != B:
        xw = jnp.pad(xw, ((0, Bp - B), (0, 0), (0, 0), (0, 0)))
    NP = Bp // _PACK

    # Pack _PACK batch elements into the lane axis -> lane-dense (C, L) slabs.
    x_packed = jnp.transpose(xw.reshape(NP, _PACK, C, VT),
                             (0, 2, 1, 3)).reshape(NP, C, L)

    smats = jnp.asarray(_build_shift_masks(V, T, _PACK))   # (9, L, L) constant
    bias = jnp.asarray(_build_attn_bias(V, T, _PACK))      # (L, L) constant
    sigma_arr = jnp.reshape(sigma, (1,)).astype(jnp.float32)

    flops = 2 * NP * (9 * C * L * L + 9 * C2 * L * L + QKP * 9 * C * L
                      + qk_rows * L * L + C2 * L * L + C * 9 * C2 * L)
    transc = NP * (L * L + 2 * qk_rows * L + L)
    bytes_acc = 4 * (NP * 2 * C * L + 9 * L * L + L * L
                     + QKP * 9 * C + C * 9 * C2)

    out_packed = pl.pallas_call(
        functools.partial(_tattn_fused_kernel, C=C, C2=C2, qk_rows=qk_rows),
        out_shape=jax.ShapeDtypeStruct((NP, C, L), jnp.float32),
        grid=(NP,),
        in_specs=[
            pl.BlockSpec((1, C, L), lambda p: (p, 0, 0)),
            pl.BlockSpec((9, L, L), lambda p: (0, 0, 0)),   # resident constant
            pl.BlockSpec((L, L), lambda p: (0, 0)),         # resident constant
            pl.BlockSpec((QKP, 9 * C), lambda p: (0, 0)),   # resident weights
            pl.BlockSpec((C, 9 * C2), lambda p: (0, 0)),    # resident weights
            pl.BlockSpec(memory_space=pltpu.MemorySpace.SMEM),
        ],
        out_specs=pl.BlockSpec((1, C, L), lambda p: (p, 0, 0)),
        scratch_shapes=[
            pltpu.VMEM((9 * C, L), jnp.float32),
            pltpu.VMEM((9 * C2, L), jnp.float32),
        ],
        input_output_aliases={0: 0},            # reuse packed-x buffer for out
        compiler_params=pltpu.CompilerParams(
            dimension_semantics=("parallel",)),
        cost_estimate=pl.CostEstimate(flops=flops, transcendentals=transc,
                                      bytes_accessed=bytes_acc),
    )(x_packed, smats, bias, wqkv2d, wav2d, sigma_arr)

    out = jnp.transpose(out_packed.reshape(NP, C, _PACK, VT),
                        (0, 2, 1, 3)).reshape(Bp, C, V, T)
    return out[:B].astype(x.dtype)


# ----------------------------------------------------------------------------
# Pure-JAX reference (mirrors the PyTorch module) for verification.
# ----------------------------------------------------------------------------
def tattn_reference(x, wq, wk, wv, wav, sigma):
    def conv(xx, ww):
        return lax.conv_general_dilated(
            xx, ww, window_strides=(1, 1), padding=((1, 1), (1, 1)),
            dimension_numbers=("NCHW", "OIHW", "NCHW"))

    B, C, V, T = x.shape
    q = conv(x, wq)
    k = conv(x, wk)
    val = conv(x, wv)
    q = jnp.transpose(q, (0, 2, 3, 1)).reshape(B * V, T, -1)
    k = jnp.transpose(k, (0, 2, 1, 3)).reshape(B * V, -1, T)
    val = jnp.transpose(val, (0, 2, 3, 1)).reshape(B * V, T, -1)
    attn = jax.nn.softmax(jnp.matmul(jnp.tanh(q), jnp.tanh(k)), axis=-1)
    av = jnp.matmul(attn, val)
    av = jnp.transpose(av.reshape(B, V, T, -1), (0, 3, 1, 2))
    av = conv(av, wav)
    return x + sigma * av


if __name__ == "__main__":
    B, C, V, T = 2, 16, 8, 8
    C8, C2 = C // 8, C // 2

    key = jax.random.PRNGKey(0)
    k1, k2, k3, k4, k5 = jax.random.split(key, 5)
    x = jax.random.normal(k1, (B, C, V, T), jnp.float32)
    wq = jax.random.normal(k2, (C8, C, 3, 3), jnp.float32) * 0.1
    wk = jax.random.normal(k3, (C8, C, 3, 3), jnp.float32) * 0.1
    wv = jax.random.normal(k4, (C2, C, 3, 3), jnp.float32) * 0.1
    wav = jax.random.normal(k5, (C, C2, 3, 3), jnp.float32) * 0.1
    # nn.Parameter(torch.zeros(1)) inits sigma=0 (output == x); use a nonzero
    # value so the attention path is actually exercised by the check.
    sigma = jnp.float32(0.5)

    # Weight prep once, outside the jitted forward (parameter-load time).
    wqkv2d, wav2d, _ = prepare_tattn_params(wq, wk, wv, wav)

    out = tattn_forward(x, wqkv2d, wav2d, sigma)
    out = jax.block_until_ready(out)

    ref = tattn_reference(x, wq, wk, wv, wav, sigma)
    max_err = float(jnp.max(jnp.abs(out - ref)))
    assert jnp.allclose(out, ref, rtol=1e-3, atol=1e-3), max_err
    print("KERNEL_OK")
</pallas_src>

<mosaic_0001>
module attributes {stable_mosaic.version = 11 : i64} {
  func.func @_tattn_fused_kernel(%arg0: i32, %arg1: memref<1x16x128xf32, #tpu.memory_space<vmem>>, %arg2: memref<9x128x128xf32, #tpu.memory_space<vmem>>, %arg3: memref<128x128xf32, #tpu.memory_space<vmem>>, %arg4: memref<24x144xf32, #tpu.memory_space<vmem>>, %arg5: memref<16x72xf32, #tpu.memory_space<vmem>>, %arg6: memref<1xf32, #tpu.memory_space<smem>>, %arg7: memref<1x16x128xf32, #tpu.memory_space<vmem>>, %arg8: memref<144x128xf32, #tpu.memory_space<vmem>>, %arg9: memref<72x128xf32, #tpu.memory_space<vmem>>) attributes {dimension_semantics = [#tpu.dimension_semantics<parallel>], iteration_bounds = array<i64: 1>, scalar_prefetch = 0 : i64, scratch_operands = 2 : i64, tpu.core_type = #tpu.core_type<tc>, window_params = [{transform_indices = @transform_0, window_bounds = array<i64: 1, 16, 128>}, {pipeline_mode = #tpu.pipeline_mode<synchronous>, transform_indices = @transform_1, window_bounds = array<i64: 9, 128, 128>}, {pipeline_mode = #tpu.pipeline_mode<synchronous>, transform_indices = @transform_2, window_bounds = array<i64: 128, 128>}, {pipeline_mode = #tpu.pipeline_mode<synchronous>, transform_indices = @transform_3, window_bounds = array<i64: 24, 144>}, {pipeline_mode = #tpu.pipeline_mode<synchronous>, transform_indices = @transform_4, window_bounds = array<i64: 16, 72>}, {transform_indices = @transform_5, window_bounds = array<i64: 1>}, {transform_indices = @transform_6, window_bounds = array<i64: 1, 16, 128>}]} {
    %c0 = arith.constant 0 : index
    %c0_0 = arith.constant 0 : index
    %c0_1 = arith.constant 0 : index
    %0 = vector.load %arg1[%c0, %c0_0, %c0_1] : memref<1x16x128xf32, #tpu.memory_space<vmem>>, vector<1x16x128xf32>
    %1 = vector.shape_cast %0 : vector<1x16x128xf32> to vector<16x128xf32>
    %c0_2 = arith.constant 0 : index
    %c0_3 = arith.constant 0 : index
    %c0_4 = arith.constant 0 : index
    %2 = vector.load %arg2[%c0_2, %c0_3, %c0_4] : memref<9x128x128xf32, #tpu.memory_space<vmem>>, vector<1x128x128xf32>
    %3 = vector.shape_cast %2 : vector<1x128x128xf32> to vector<128x128xf32>
    %cst = arith.constant dense<0.000000e+00> : vector<16x128xf32>
    %4 = tpu.matmul %1, %3, %cst {dimension_numbers = #tpu.dot_dimension_numbers<[1], [0], [0], [1], [0, 0, 1, 1], [], []>} : vector<16x128xf32>, vector<128x128xf32>, vector<16x128xf32> -> vector<16x128xf32>
    %c0_5 = arith.constant 0 : index
    %c0_6 = arith.constant 0 : index
    %5 = vector.load %arg8[%c0_5, %c0_6] : memref<144x128xf32, #tpu.memory_space<vmem>>, vector<16x128xf32>
    tpu.vector_store %arg8[%c0_5, %c0_6], %4 {strides = array<i32>} : memref<144x128xf32, #tpu.memory_space<vmem>>, vector<16x128xf32>,
    %c1 = arith.constant 1 : index
    %c0_7 = arith.constant 0 : index
    %c0_8 = arith.constant 0 : index
    %6 = vector.load %arg2[%c1, %c0_7, %c0_8] : memref<9x128x128xf32, #tpu.memory_space<vmem>>, vector<1x128x128xf32>
    %7 = vector.shape_cast %6 : vector<1x128x128xf32> to vector<128x128xf32>
    %cst_9 = arith.constant dense<0.000000e+00> : vector<16x128xf32>
    %8 = tpu.matmul %1, %7, %cst_9 {dimension_numbers = #tpu.dot_dimension_numbers<[1], [0], [0], [1], [0, 0, 1, 1], [], []>} : vector<16x128xf32>, vector<128x128xf32>, vector<16x128xf32> -> vector<16x128xf32>
    %c16 = arith.constant 16 : index
    %c0_10 = arith.constant 0 : index
    %9 = vector.load %arg8[%c16, %c0_10] : memref<144x128xf32, #tpu.memory_space<vmem>>, vector<16x128xf32>
    tpu.vector_store %arg8[%c16, %c0_10], %8 {strides = array<i32>} : memref<144x128xf32, #tpu.memory_space<vmem>>, vector<16x128xf32>,
    %c2 = arith.constant 2 : index
    %c0_11 = arith.constant 0 : index
    %c0_12 = arith.constant 0 : index
    %10 = vector.load %arg2[%c2, %c0_11, %c0_12] : memref<9x128x128xf32, #tpu.memory_space<vmem>>, vector<1x128x128xf32>
    %11 = vector.shape_cast %10 : vector<1x128x128xf32> to vector<128x128xf32>
    %cst_13 = arith.constant dense<0.000000e+00> : vector<16x128xf32>
    %12 = tpu.matmul %1, %11, %cst_13 {dimension_numbers = #tpu.dot_dimension_numbers<[1], [0], [0], [1], [0, 0, 1, 1], [], []>} : vector<16x128xf32>, vector<128x128xf32>, vector<16x128xf32> -> vector<16x128xf32>
    %c32 = arith.constant 32 : index
    %c0_14 = arith.constant 0 : index
    %13 = vector.load %arg8[%c32, %c0_14] : memref<144x128xf32, #tpu.memory_space<vmem>>, vector<16x128xf32>
    tpu.vector_store %arg8[%c32, %c0_14], %12 {strides = array<i32>} : memref<144x128xf32, #tpu.memory_space<vmem>>, vector<16x128xf32>,
    %c3 = arith.constant 3 : index
    %c0_15 = arith.constant 0 : index
    %c0_16 = arith.constant 0 : index
    %14 = vector.load %arg2[%c3, %c0_15, %c0_16] : memref<9x128x128xf32, #tpu.memory_space<vmem>>, vector<1x128x128xf32>
    %15 = vector.shape_cast %14 : vector<1x128x128xf32> to vector<128x128xf32>
    %cst_17 = arith.constant dense<0.000000e+00> : vector<16x128xf32>
    %16 = tpu.matmul %1, %15, %cst_17 {dimension_numbers = #tpu.dot_dimension_numbers<[1], [0], [0], [1], [0, 0, 1, 1], [], []>} : vector<16x128xf32>, vector<128x128xf32>, vector<16x128xf32> -> vector<16x128xf32>
    %c48 = arith.constant 48 : index
    %c0_18 = arith.constant 0 : index
    %17 = vector.load %arg8[%c48, %c0_18] : memref<144x128xf32, #tpu.memory_space<vmem>>, vector<16x128xf32>
    tpu.vector_store %arg8[%c48, %c0_18], %16 {strides = array<i32>} : memref<144x128xf32, #tpu.memory_space<vmem>>, vector<16x128xf32>,
    %c4 = arith.constant 4 : index
    %c0_19 = arith.constant 0 : index
    %c0_20 = arith.constant 0 : index
    %18 = vector.load %arg2[%c4, %c0_19, %c0_20] : memref<9x128x128xf32, #tpu.memory_space<vmem>>, vector<1x128x128xf32>
    %19 = vector.shape_cast %18 : vector<1x128x128xf32> to vector<128x128xf32>
    %cst_21 = arith.constant dense<0.000000e+00> : vector<16x128xf32>
    %20 = tpu.matmul %1, %19, %cst_21 {dimension_numbers = #tpu.dot_dimension_numbers<[1], [0], [0], [1], [0, 0, 1, 1], [], []>} : vector<16x128xf32>, vector<128x128xf32>, vector<16x128xf32> -> vector<16x128xf32>
    %c64 = arith.constant 64 : index
    %c0_22 = arith.constant 0 : index
    %21 = vector.load %arg8[%c64, %c0_22] : memref<144x128xf32, #tpu.memory_space<vmem>>, vector<16x128xf32>
    tpu.vector_store %arg8[%c64, %c0_22], %20 {strides = array<i32>} : memref<144x128xf32, #tpu.memory_space<vmem>>, vector<16x128xf32>,
    %c5 = arith.constant 5 : index
    %c0_23 = arith.constant 0 : index
    %c0_24 = arith.constant 0 : index
    %22 = vector.load %arg2[%c5, %c0_23, %c0_24] : memref<9x128x128xf32, #tpu.memory_space<vmem>>, vector<1x128x128xf32>
    %23 = vector.shape_cast %22 : vector<1x128x128xf32> to vector<128x128xf32>
    %cst_25 = arith.constant dense<0.000000e+00> : vector<16x128xf32>
    %24 = tpu.matmul %1, %23, %cst_25 {dimension_numbers = #tpu.dot_dimension_numbers<[1], [0], [0], [1], [0, 0, 1, 1], [], []>} : vector<16x128xf32>, vector<128x128xf32>, vector<16x128xf32> -> vector<16x128xf32>
    %c80 = arith.constant 80 : index
    %c0_26 = arith.constant 0 : index
    %25 = vector.load %arg8[%c80, %c0_26] : memref<144x128xf32, #tpu.memory_space<vmem>>, vector<16x128xf32>
    tpu.vector_store %arg8[%c80, %c0_26], %24 {strides = array<i32>} : memref<144x128xf32, #tpu.memory_space<vmem>>, vector<16x128xf32>,
    %c6 = arith.constant 6 : index
    %c0_27 = arith.constant 0 : index
    %c0_28 = arith.constant 0 : index
    %26 = vector.load %arg2[%c6, %c0_27, %c0_28] : memref<9x128x128xf32, #tpu.memory_space<vmem>>, vector<1x128x128xf32>
    %27 = vector.shape_cast %26 : vector<1x128x128xf32> to vector<128x128xf32>
    %cst_29 = arith.constant dense<0.000000e+00> : vector<16x128xf32>
    %28 = tpu.matmul %1, %27, %cst_29 {dimension_numbers = #tpu.dot_dimension_numbers<[1], [0], [0], [1], [0, 0, 1, 1], [], []>} : vector<16x128xf32>, vector<128x128xf32>, vector<16x128xf32> -> vector<16x128xf32>
    %c96 = arith.constant 96 : index
    %c0_30 = arith.constant 0 : index
    %29 = vector.load %arg8[%c96, %c0_30] : memref<144x128xf32, #tpu.memory_space<vmem>>, vector<16x128xf32>
    tpu.vector_store %arg8[%c96, %c0_30], %28 {strides = array<i32>} : memref<144x128xf32, #tpu.memory_space<vmem>>, vector<16x128xf32>,
    %c7 = arith.constant 7 : index
    %c0_31 = arith.constant 0 : index
    %c0_32 = arith.constant 0 : index
    %30 = vector.load %arg2[%c7, %c0_31, %c0_32] : memref<9x128x128xf32, #tpu.memory_space<vmem>>, vector<1x128x128xf32>
    %31 = vector.shape_cast %30 : vector<1x128x128xf32> to vector<128x128xf32>
    %cst_33 = arith.constant dense<0.000000e+00> : vector<16x128xf32>
    %32 = tpu.matmul %1, %31, %cst_33 {dimension_numbers = #tpu.dot_dimension_numbers<[1], [0], [0], [1], [0, 0, 1, 1], [], []>} : vector<16x128xf32>, vector<128x128xf32>, vector<16x128xf32> -> vector<16x128xf32>
    %c112 = arith.constant 112 : index
    %c0_34 = arith.constant 0 : index
    %33 = vector.load %arg8[%c112, %c0_34] : memref<144x128xf32, #tpu.memory_space<vmem>>, vector<16x128xf32>
    tpu.vector_store %arg8[%c112, %c0_34], %32 {strides = array<i32>} : memref<144x128xf32, #tpu.memory_space<vmem>>, vector<16x128xf32>,
    %c8 = arith.constant 8 : index
    %c0_35 = arith.constant 0 : index
    %c0_36 = arith.constant 0 : index
    %34 = vector.load %arg2[%c8, %c0_35, %c0_36] : memref<9x128x128xf32, #tpu.memory_space<vmem>>, vector<1x128x128xf32>
    %35 = vector.shape_cast %34 : vector<1x128x128xf32> to vector<128x128xf32>
    %cst_37 = arith.constant dense<0.000000e+00> : vector<16x128xf32>
    %36 = tpu.matmul %1, %35, %cst_37 {dimension_numbers = #tpu.dot_dimension_numbers<[1], [0], [0], [1], [0, 0, 1, 1], [], []>} : vector<16x128xf32>, vector<128x128xf32>, vector<16x128xf32> -> vector<16x128xf32>
    %c128 = arith.constant 128 : index
    %c0_38 = arith.constant 0 : index
    %37 = vector.load %arg8[%c128, %c0_38] : memref<144x128xf32, #tpu.memory_space<vmem>>, vector<16x128xf32>
    tpu.vector_store %arg8[%c128, %c0_38], %36 {strides = array<i32>} : memref<144x128xf32, #tpu.memory_space<vmem>>, vector<16x128xf32>,
    %c0_39 = arith.constant 0 : index
    %c0_40 = arith.constant 0 : index
    %38 = vector.load %arg4[%c0_39, %c0_40] : memref<24x144xf32, #tpu.memory_space<vmem>>, vector<24x144xf32>
    %c0_41 = arith.constant 0 : index
    %c0_42 = arith.constant 0 : index
    %39 = vector.load %arg8[%c0_41, %c0_42] : memref<144x128xf32, #tpu.memory_space<vmem>>, vector<144x128xf32>
    %cst_43 = arith.constant dense<0.000000e+00> : vector<24x128xf32>
    %40 = tpu.matmul %38, %39, %cst_43 {dimension_numbers = #tpu.dot_dimension_numbers<[1], [0], [0], [1], [0, 0, 1, 1], [], []>} : vector<24x144xf32>, vector<144x128xf32>, vector<24x128xf32> -> vector<24x128xf32>
    %41 = vector.extract_strided_slice %40 {offsets = [0, 0], sizes = [8, 128], strides = [1, 1]} : vector<24x128xf32> to vector<8x128xf32>
    %42 = math.tanh %41 : vector<8x128xf32>
    %43 = vector.extract_strided_slice %40 {offsets = [8, 0], sizes = [8, 128], strides = [1, 1]} : vector<24x128xf32> to vector<8x128xf32>
    %44 = math.tanh %43 : vector<8x128xf32>
    %45 = vector.extract_strided_slice %40 {offsets = [16, 0], sizes = [8, 128], strides = [1, 1]} : vector<24x128xf32> to vector<8x128xf32>
    %cst_44 = arith.constant dense<0.000000e+00> : vector<128x128xf32>
    %46 = tpu.matmul %42, %44, %cst_44 {dimension_numbers = #tpu.dot_dimension_numbers<[0], [0], [1], [1], [0, 1, 1, 1], [], []>} : vector<8x128xf32>, vector<8x128xf32>, vector<128x128xf32> -> vector<128x128xf32>
    %c0_45 = arith.constant 0 : index
    %c0_46 = arith.constant 0 : index
    %47 = vector.load %arg3[%c0_45, %c0_46] : memref<128x128xf32, #tpu.memory_space<vmem>>, vector<128x128xf32>
    %48 = arith.addf %46, %47 : vector<128x128xf32>
    %cst_47 = arith.constant dense<0xFF800000> : vector<128xf32>
    %49 = vector.multi_reduction <maximumf>, %48, %cst_47 [1] : vector<128x128xf32> to vector<128xf32>
    %50 = vector.shape_cast %49 : vector<128xf32> to vector<128x1xf32>
    %51 = vector.broadcast %50 : vector<128x1xf32> to vector<128x128xf32>
    %52 = arith.subf %48, %51 : vector<128x128xf32>
    %53 = math.exp %52 : vector<128x128xf32>
    %cst_48 = arith.constant dense<0.000000e+00> : vector<128xf32>
    %54 = vector.multi_reduction <add>, %53, %cst_48 [1] : vector<128x128xf32> to vector<128xf32>
    %55 = vector.shape_cast %54 : vector<128xf32> to vector<128x1xf32>
    %56 = tpu.reciprocal %55 {approx = true} : vector<128x1xf32> -> vector<128x1xf32>
    %57 = arith.mulf %55, %56 : vector<128x1xf32>
    %cst_49 = arith.constant 2.000000e+00 : f32
    %58 = vector.broadcast %cst_49 : f32 to vector<128x1xf32>
    %59 = arith.subf %58, %57 : vector<128x1xf32>
    %60 = arith.mulf %56, %59 : vector<128x1xf32>
    %61 = vector.broadcast %60 : vector<128x1xf32> to vector<128x128xf32>
    %62 = arith.mulf %53, %61 : vector<128x128xf32>
    %cst_50 = arith.constant dense<0.000000e+00> : vector<8x128xf32>
    %63 = tpu.matmul %45, %62, %cst_50 {dimension_numbers = #tpu.dot_dimension_numbers<[1], [1], [0], [0], [0, 0, 1, 0], [], []>} : vector<8x128xf32>, vector<128x128xf32>, vector<8x128xf32> -> vector<8x128xf32>
    %c0_51 = arith.constant 0 : index
    %c0_52 = arith.constant 0 : index
    %c0_53 = arith.constant 0 : index
    %64 = vector.load %arg2[%c0_51, %c0_52, %c0_53] : memref<9x128x128xf32, #tpu.memory_space<vmem>>, vector<1x128x128xf32>
    %65 = vector.shape_cast %64 : vector<1x128x128xf32> to vector<128x128xf32>
    %cst_54 = arith.constant dense<0.000000e+00> : vector<8x128xf32>
    %66 = tpu.matmul %63, %65, %cst_54 {dimension_numbers = #tpu.dot_dimension_numbers<[1], [0], [0], [1], [0, 0, 1, 1], [], []>} : vector<8x128xf32>, vector<128x128xf32>, vector<8x128xf32> -> vector<8x128xf32>
    %c0_55 = arith.constant 0 : index
    %c0_56 = arith.constant 0 : index
    %67 = vector.load %arg9[%c0_55, %c0_56] : memref<72x128xf32, #tpu.memory_space<vmem>>, vector<8x128xf32>
    tpu.vector_store %arg9[%c0_55, %c0_56], %66 {strides = array<i32>} : memref<72x128xf32, #tpu.memory_space<vmem>>, vector<8x128xf32>,
    %c1_57 = arith.constant 1 : index
    %c0_58 = arith.constant 0 : index
    %c0_59 = arith.constant 0 : index
    %68 = vector.load %arg2[%c1_57, %c0_58, %c0_59] : memref<9x128x128xf32, #tpu.memory_space<vmem>>, vector<1x128x128xf32>
    %69 = vector.shape_cast %68 : vector<1x128x128xf32> to vector<128x128xf32>
    %cst_60 = arith.constant dense<0.000000e+00> : vector<8x128xf32>
    %70 = tpu.matmul %63, %69, %cst_60 {dimension_numbers = #tpu.dot_dimension_numbers<[1], [0], [0], [1], [0, 0, 1, 1], [], []>} : vector<8x128xf32>, vector<128x128xf32>, vector<8x128xf32> -> vector<8x128xf32>
    %c8_61 = arith.constant 8 : index
    %c0_62 = arith.constant 0 : index
    %71 = vector.load %arg9[%c8_61, %c0_62] : memref<72x128xf32, #tpu.memory_space<vmem>>, vector<8x128xf32>
    tpu.vector_store %arg9[%c8_61, %c0_62], %70 {strides = array<i32>} : memref<72x128xf32, #tpu.memory_space<vmem>>, vector<8x128xf32>,
    %c2_63 = arith.constant 2 : index
    %c0_64 = arith.constant 0 : index
    %c0_65 = arith.constant 0 : index
    %72 = vector.load %arg2[%c2_63, %c0_64, %c0_65] : memref<9x128x128xf32, #tpu.memory_space<vmem>>, vector<1x128x128xf32>
    %73 = vector.shape_cast %72 : vector<1x128x128xf32> to vector<128x128xf32>
    %cst_66 = arith.constant dense<0.000000e+00> : vector<8x128xf32>
    %74 = tpu.matmul %63, %73, %cst_66 {dimension_numbers = #tpu.dot_dimension_numbers<[1], [0], [0], [1], [0, 0, 1, 1], [], []>} : vector<8x128xf32>, vector<128x128xf32>, vector<8x128xf32> -> vector<8x128xf32>
    %c16_67 = arith.constant 16 : index
    %c0_68 = arith.constant 0 : index
    %75 = vector.load %arg9[%c16_67, %c0_68] : memref<72x128xf32, #tpu.memory_space<vmem>>, vector<8x128xf32>
    tpu.vector_store %arg9[%c16_67, %c0_68], %74 {strides = array<i32>} : memref<72x128xf32, #tpu.memory_space<vmem>>, vector<8x128xf32>,
    %c3_69 = arith.constant 3 : index
    %c0_70 = arith.constant 0 : index
    %c0_71 = arith.constant 0 : index
    %76 = vector.load %arg2[%c3_69, %c0_70, %c0_71] : memref<9x128x128xf32, #tpu.memory_space<vmem>>, vector<1x128x128xf32>
    %77 = vector.shape_cast %76 : vector<1x128x128xf32> to vector<128x128xf32>
    %cst_72 = arith.constant dense<0.000000e+00> : vector<8x128xf32>
    %78 = tpu.matmul %63, %77, %cst_72 {dimension_numbers = #tpu.dot_dimension_numbers<[1], [0], [0], [1], [0, 0, 1, 1], [], []>} : vector<8x128xf32>, vector<128x128xf32>, vector<8x128xf32> -> vector<8x128xf32>
    %c24 = arith.constant 24 : index
    %c0_73 = arith.constant 0 : index
    %79 = vector.load %arg9[%c24, %c0_73] : memref<72x128xf32, #tpu.memory_space<vmem>>, vector<8x128xf32>
    tpu.vector_store %arg9[%c24, %c0_73], %78 {strides = array<i32>} : memref<72x128xf32, #tpu.memory_space<vmem>>, vector<8x128xf32>,
    %c4_74 = arith.constant 4 : index
    %c0_75 = arith.constant 0 : index
    %c0_76 = arith.constant 0 : index
    %80 = vector.load %arg2[%c4_74, %c0_75, %c0_76] : memref<9x128x128xf32, #tpu.memory_space<vmem>>, vector<1x128x128xf32>
    %81 = vector.shape_cast %80 : vector<1x128x128xf32> to vector<128x128xf32>
    %cst_77 = arith.constant dense<0.000000e+00> : vector<8x128xf32>
    %82 = tpu.matmul %63, %81, %cst_77 {dimension_numbers = #tpu.dot_dimension_numbers<[1], [0], [0], [1], [0, 0, 1, 1], [], []>} : vector<8x128xf32>, vector<128x128xf32>, vector<8x128xf32> -> vector<8x128xf32>
    %c32_78 = arith.constant 32 : index
    %c0_79 = arith.constant 0 : index
    %83 = vector.load %arg9[%c32_78, %c0_79] : memref<72x128xf32, #tpu.memory_space<vmem>>, vector<8x128xf32>
    tpu.vector_store %arg9[%c32_78, %c0_79], %82 {strides = array<i32>} : memref<72x128xf32, #tpu.memory_space<vmem>>, vector<8x128xf32>,
    %c5_80 = arith.constant 5 : index
    %c0_81 = arith.constant 0 : index
    %c0_82 = arith.constant 0 : index
    %84 = vector.load %arg2[%c5_80, %c0_81, %c0_82] : memref<9x128x128xf32, #tpu.memory_space<vmem>>, vector<1x128x128xf32>
    %85 = vector.shape_cast %84 : vector<1x128x128xf32> to vector<128x128xf32>
    %cst_83 = arith.constant dense<0.000000e+00> : vector<8x128xf32>
    %86 = tpu.matmul %63, %85, %cst_83 {dimension_numbers = #tpu.dot_dimension_numbers<[1], [0], [0], [1], [0, 0, 1, 1], [], []>} : vector<8x128xf32>, vector<128x128xf32>, vector<8x128xf32> -> vector<8x128xf32>
    %c40 = arith.constant 40 : index
    %c0_84 = arith.constant 0 : index
    %87 = vector.load %arg9[%c40, %c0_84] : memref<72x128xf32, #tpu.memory_space<vmem>>, vector<8x128xf32>
    tpu.vector_store %arg9[%c40, %c0_84], %86 {strides = array<i32>} : memref<72x128xf32, #tpu.memory_space<vmem>>, vector<8x128xf32>,
    %c6_85 = arith.constant 6 : index
    %c0_86 = arith.constant 0 : index
    %c0_87 = arith.constant 0 : index
    %88 = vector.load %arg2[%c6_85, %c0_86, %c0_87] : memref<9x128x128xf32, #tpu.memory_space<vmem>>, vector<1x128x128xf32>
    %89 = vector.shape_cast %88 : vector<1x128x128xf32> to vector<128x128xf32>
    %cst_88 = arith.constant dense<0.000000e+00> : vector<8x128xf32>
    %90 = tpu.matmul %63, %89, %cst_88 {dimension_numbers = #tpu.dot_dimension_numbers<[1], [0], [0], [1], [0, 0, 1, 1], [], []>} : vector<8x128xf32>, vector<128x128xf32>, vector<8x128xf32> -> vector<8x128xf32>
    %c48_89 = arith.constant 48 : index
    %c0_90 = arith.constant 0 : index
    %91 = vector.load %arg9[%c48_89, %c0_90] : memref<72x128xf32, #tpu.memory_space<vmem>>, vector<8x128xf32>
    tpu.vector_store %arg9[%c48_89, %c0_90], %90 {strides = array<i32>} : memref<72x128xf32, #tpu.memory_space<vmem>>, vector<8x128xf32>,
    %c7_91 = arith.constant 7 : index
    %c0_92 = arith.constant 0 : index
    %c0_93 = arith.constant 0 : index
    %92 = vector.load %arg2[%c7_91, %c0_92, %c0_93] : memref<9x128x128xf32, #tpu.memory_space<vmem>>, vector<1x128x128xf32>
    %93 = vector.shape_cast %92 : vector<1x128x128xf32> to vector<128x128xf32>
    %cst_94 = arith.constant dense<0.000000e+00> : vector<8x128xf32>
    %94 = tpu.matmul %63, %93, %cst_94 {dimension_numbers = #tpu.dot_dimension_numbers<[1], [0], [0], [1], [0, 0, 1, 1], [], []>} : vector<8x128xf32>, vector<128x128xf32>, vector<8x128xf32> -> vector<8x128xf32>
    %c56 = arith.constant 56 : index
    %c0_95 = arith.constant 0 : index
    %95 = vector.load %arg9[%c56, %c0_95] : memref<72x128xf32, #tpu.memory_space<vmem>>, vector<8x128xf32>
    tpu.vector_store %arg9[%c56, %c0_95], %94 {strides = array<i32>} : memref<72x128xf32, #tpu.memory_space<vmem>>, vector<8x128xf32>,
    %c8_96 = arith.constant 8 : index
    %c0_97 = arith.constant 0 : index
    %c0_98 = arith.constant 0 : index
    %96 = vector.load %arg2[%c8_96, %c0_97, %c0_98] : memref<9x128x128xf32, #tpu.memory_space<vmem>>, vector<1x128x128xf32>
    %97 = vector.shape_cast %96 : vector<1x128x128xf32> to vector<128x128xf32>
    %cst_99 = arith.constant dense<0.000000e+00> : vector<8x128xf32>
    %98 = tpu.matmul %63, %97, %cst_99 {dimension_numbers = #tpu.dot_dimension_numbers<[1], [0], [0], [1], [0, 0, 1, 1], [], []>} : vector<8x128xf32>, vector<128x128xf32>, vector<8x128xf32> -> vector<8x128xf32>
    %c64_100 = arith.constant 64 : index
    %c0_101 = arith.constant 0 : index
    %99 = vector.load %arg9[%c64_100, %c0_101] : memref<72x128xf32, #tpu.memory_space<vmem>>, vector<8x128xf32>
    tpu.vector_store %arg9[%c64_100, %c0_101], %98 {strides = array<i32>} : memref<72x128xf32, #tpu.memory_space<vmem>>, vector<8x128xf32>,
    %c0_102 = arith.constant 0 : index
    %c0_103 = arith.constant 0 : index
    %100 = vector.load %arg5[%c0_102, %c0_103] : memref<16x72xf32, #tpu.memory_space<vmem>>, vector<16x72xf32>
    %c0_104 = arith.constant 0 : index
    %c0_105 = arith.constant 0 : index
    %101 = vector.load %arg9[%c0_104, %c0_105] : memref<72x128xf32, #tpu.memory_space<vmem>>, vector<72x128xf32>
    %cst_106 = arith.constant dense<0.000000e+00> : vector<16x128xf32>
    %102 = tpu.matmul %100, %101, %cst_106 {dimension_numbers = #tpu.dot_dimension_numbers<[1], [0], [0], [1], [0, 0, 1, 1], [], []>} : vector<16x72xf32>, vector<72x128xf32>, vector<16x128xf32> -> vector<16x128xf32>
    %c0_107 = arith.constant 0 : index
    %103 = memref.load %arg6[%c0_107] : memref<1xf32, #tpu.memory_space<smem>>
    %104 = vector.broadcast %103 : f32 to vector<16x128xf32>
    %105 = arith.mulf %104, %102 : vector<16x128xf32>
    %106 = arith.addf %1, %105 : vector<16x128xf32>
    %c0_108 = arith.constant 0 : index
    %c0_109 = arith.constant 0 : index
    %c0_110 = arith.constant 0 : index
    %107 = vector.load %arg7[%c0_108, %c0_109, %c0_110] : memref<1x16x128xf32, #tpu.memory_space<vmem>>, vector<1x16x128xf32>
    %108 = vector.shape_cast %107 : vector<1x16x128xf32> to vector<16x128xf32>
    %109 = vector.shape_cast %106 : vector<16x128xf32> to vector<1x16x128xf32>
    tpu.vector_store %arg7[%c0_108, %c0_109, %c0_110], %109 {strides = array<i32>} : memref<1x16x128xf32, #tpu.memory_space<vmem>>, vector<1x16x128xf32>,
    return
  }
  func.func @transform_0(%arg0: i32) -> (i32, i32, i32) {
    %c0_i32 = arith.constant 0 : i32
    %c0_i32_0 = arith.constant 0 : i32
    %c0_i32_1 = arith.constant 0 : i32
    return %arg0, %c0_i32, %c0_i32_0 : i32, i32, i32
  }
  func.func @transform_1(%arg0: i32) -> (i32, i32, i32) {
    %c0_i32 = arith.constant 0 : i32
    %c0_i32_0 = arith.constant 0 : i32
    %c0_i32_1 = arith.constant 0 : i32
    %c0_i32_2 = arith.constant 0 : i32
    return %c0_i32, %c0_i32_0, %c0_i32_1 : i32, i32, i32
  }
  func.func @transform_2(%arg0: i32) -> (i32, i32) {
    %c0_i32 = arith.constant 0 : i32
    %c0_i32_0 = arith.constant 0 : i32
    %c0_i32_1 = arith.constant 0 : i32
    return %c0_i32, %c0_i32_0 : i32, i32
  }
  func.func @transform_3(%arg0: i32) -> (i32, i32) {
    %c0_i32 = arith.constant 0 : i32
    %c0_i32_0 = arith.constant 0 : i32
    %c0_i32_1 = arith.constant 0 : i32
    return %c0_i32, %c0_i32_0 : i32, i32
  }
  func.func @transform_4(%arg0: i32) -> (i32, i32) {
    %c0_i32 = arith.constant 0 : i32
    %c0_i32_0 = arith.constant 0 : i32
    %c0_i32_1 = arith.constant 0 : i32
    return %c0_i32, %c0_i32_0 : i32, i32
  }
  func.func @transform_5(%arg0: i32) -> i32 {
    %c0_i32 = arith.constant 0 : i32
    %c0_i32_0 = arith.constant 0 : i32
    return %c0_i32 : i32
  }
  func.func @transform_6(%arg0: i32) -> (i32, i32, i32) {
    %c0_i32 = arith.constant 0 : i32
    %c0_i32_0 = arith.constant 0 : i32
    %c0_i32_1 = arith.constant 0 : i32
    return %arg0, %c0_i32, %c0_i32_0 : i32, i32, i32
  }
}

</mosaic_0001>

<bundles_post_ra>
// kernel: tattn_forward.1
= control target key start
LH: loop header
LB: loop body
LE: loop exit
PB: predicated region body
PF: predicated region fallthrough
CT: control target
= control target key end

     0   :  { %12 = vsyncpa [#allocation6], 0  ;;  %s3584_s21 = smov [#allocation5]   ;;  %s4071_s0 = inlined_call_operand.vmem [shape: f32[1,16,128], index: 0, kind: input, shape index: {}, may-alias: {0,6}]   ;;  %s4072_s1 = inlined_call_operand.hbm [shape: f32[9,128,128], index: 1, kind: input, shape index: {}]   ;;  %s4073_s2 = inlined_call_operand.vmem [shape: f32[128,128], index: 2, kind: input, shape index: {}]   ;;  %s4074_s3 = inlined_call_operand.vmem [shape: f32[24,144], index: 3, kind: input, shape index: {}]   ;;  %s4075_s4 = inlined_call_operand.vmem [shape: f32[16,72], index: 4, kind: input, shape index: {}]   ;;  %s4076_s5 = inlined_call_operand.<no memory space> [shape: f32[1], index: 5, kind: input, shape index: {}]   ;;  %s4077_s6 = inlined_call_operand.vmem [shape: f32[1,16,128], index: 6, kind: output, shape index: {}, may-alias: {0,6}]  }
   0x1   :  { %s20_s22 = sshll.u32 %s3584_s21, 4  ;;  %s21_s22 = int_to_ptr.vmem [resolvable:$true] %s20_s22 }
   0x2   :  { %s3570_s23 = scalar_lea.vmem %s21_s22, 18432  ;;  %p3575_p1 = scmp.lt.s32.totalorder %s21_s22, %s21_s22 }
   0x3   :  { %p3571_p0 = scmp.ne.s32.totalorder %s21_s22, %s3570_s23  ;;  %p3576_p2 = scmp.lt.s32.totalorder %s3570_s23, %s3570_s23 }
   0x5   :  { %p3577_p3 = por %p3576_p2, %p3575_p1 }
   0x7   :  { %p3578_p4 = pnand %p3577_p3, %p3571_p0 }
   0x9   :  { %3581 = shalt.err (!%p3578_p4)
}
   0xa   :  { %s3585_s24 = smov 128   ;;  %s3586_s25 = smov 8  }
   0xb   :  { %26 = dma.hbm_to_vmem [thread:$0]  %s4072_s1, 18432, %s21_s22, [#allocation6], %s3585_s24, %s3585_s24, %s3586_s25  }
   0xc   :  { %3582 = dma.done.wait [#allocation6], 18432  }
   0xd   :  { %3583 = vsyncadd [#allocation6], 4294948864  ;;  %v55_v0 = vld [vmem:[#allocation5 + $0x78] sm:$0xff]  ;;  %v54_v2 = vld [vmem:[#allocation5 + $0x70] sm:$0xff]  ;;  %vm909_vm0 = vcmask 130048   ;;  %vm1049_vm1 = vcmask 64512  }
   0xe   :  { %v149_v1 = vld [vmem:[#allocation5 + $0xf8] sm:$0xff]  ;;  %2775 = vmatprep.subr.mxu0 %v55_v0  ;;  %v148_v3 = vld [vmem:[#allocation5 + $0xf0] sm:$0xff]  ;;  %v53_v4 = vld [vmem:[#allocation5 + $0x68] sm:$0xff]  ;;  %vm3588_vm2 = vmmov 0   ;;  %vm2299_vm3 = vcmask 588800  }
   0xf   :  { %2810 = vmatprep.subr.mxu1 %v149_v1  ;;  %2776 = vmatpush3.msra.mxu0 %v55_v0  ;;  %v147_v5 = vld [vmem:[#allocation5 + $0xe8] sm:$0xff]  ;;  %v52_v6 = vld [vmem:[#allocation5 + $0x60] sm:$0xff]  ;;  %v51_v8 = vld [vmem:[#allocation5 + $0x58] sm:$0xff] }
  0x10   :  { %2811 = vmatpush3.msra.mxu1 %v149_v1  ;;  %2777 = vmatprep.subr.mxu0 %v54_v2  ;;  %v146_v7 = vld [vmem:[#allocation5 + $0xe0] sm:$0xff]  ;;  %v145_v9 = vld [vmem:[#allocation5 + $0xd8] sm:$0xff]  ;;  %v50_v10 = vld [vmem:[#allocation5 + $0x50] sm:$0xff] }
  0x11   :  { %2812 = vmatprep.subr.mxu1 %v148_v3  ;;  %2778 = vmatpush3.msra.mxu0 %v54_v2  ;;  %v144_v11 = vld [vmem:[#allocation5 + $0xd0] sm:$0xff]  ;;  %v49_v12 = vld [vmem:[#allocation5 + $0x48] sm:$0xff]  ;;  %v48_v14 = vld [vmem:[#allocation5 + $0x40] sm:$0xff] }
  0x12   :  { %2813 = vmatpush3.msra.mxu1 %v148_v3  ;;  %2779 = vmatprep.subr.mxu0 %v53_v4  ;;  %v143_v13 = vld [vmem:[#allocation5 + $0xc8] sm:$0xff]  ;;  %v142_v15 = vld [vmem:[#allocation5 + $0xc0] sm:$0xff]  ;;  %v47_v16 = vld [vmem:[#allocation5 + $0x38] sm:$0xff] }
  0x13   :  { %2814 = vmatprep.subr.mxu1 %v147_v5  ;;  %2780 = vmatpush3.msra.mxu0 %v53_v4  ;;  %v141_v17 = vld [vmem:[#allocation5 + $0xb8] sm:$0xff]  ;;  %v46_v18 = vld [vmem:[#allocation5 + $0x30] sm:$0xff]  ;;  %v45_v20 = vld [vmem:[#allocation5 + $0x28] sm:$0xff] }
  0x14   :  { %2815 = vmatpush3.msra.mxu1 %v147_v5  ;;  %2781 = vmatprep.subr.mxu0 %v52_v6  ;;  %v140_v19 = vld [vmem:[#allocation5 + $0xb0] sm:$0xff]  ;;  %v139_v21 = vld [vmem:[#allocation5 + $0xa8] sm:$0xff]  ;;  %v44_v22 = vld [vmem:[#allocation5 + $0x20] sm:$0xff] }
  0x15   :  { %2816 = vmatprep.subr.mxu1 %v146_v7  ;;  %2782 = vmatpush3.msra.mxu0 %v52_v6  ;;  %v138_v23 = vld [vmem:[#allocation5 + $0xa0] sm:$0xff]  ;;  %v43_v24 = vld [vmem:[#allocation5 + $0x18] sm:$0xff]  ;;  %v42_v26 = vld [vmem:[#allocation5 + $0x10] sm:$0xff] }
  0x16   :  { %2817 = vmatpush3.msra.mxu1 %v146_v7  ;;  %2783 = vmatprep.subr.mxu0 %v51_v8  ;;  %v137_v25 = vld [vmem:[#allocation5 + $0x98] sm:$0xff]  ;;  %v136_v27 = vld [vmem:[#allocation5 + $0x90] sm:$0xff]  ;;  %v41_v28 = vld [vmem:[#allocation5 + $0x8] sm:$0xff] }
  0x17   :  { %2818 = vmatprep.subr.mxu1 %v145_v9  ;;  %2784 = vmatpush3.msra.mxu0 %v51_v8  ;;  %v135_v29 = vld [vmem:[#allocation5 + $0x88] sm:$0xff]  ;;  %v40_v30 = vld [vmem:[#allocation5] sm:$0xff]  ;;  %v243_v34 = vld [vmem:[#allocation5 + $0x178] sm:$0xff] }
  0x18   :  { %2819 = vmatpush3.msra.mxu1 %v145_v9  ;;  %2785 = vmatprep.subr.mxu0 %v50_v10  ;;  %v134_v31 = vld [vmem:[#allocation5 + $0x80] sm:$0xff]  ;;  %v3635_v33 = vld [vmem:[%s4071_s0 + $0x8] sm:$0xff]  ;;  %v337_v35 = vld [vmem:[#allocation5 + $0x1f8] sm:$0xff] }
  0x19   :  { %2820 = vmatprep.subr.mxu1 %v144_v11  ;;  %2786 = vmatpush3.msra.mxu0 %v50_v10  ;;  %v3630_v32 = vld [vmem:[%s4071_s0] sm:$0xff]  ;;  %v242_v36 = vld [vmem:[#allocation5 + $0x170] sm:$0xff]  ;;  %v241_v38 = vld [vmem:[#allocation5 + $0x168] sm:$0xff] }
  0x1a   :  { %2821 = vmatpush3.msra.mxu1 %v144_v11  ;;  %2787 = vmatprep.subr.mxu0 %v49_v12  ;;  %v336_v37 = vld [vmem:[#allocation5 + $0x1f0] sm:$0xff]  ;;  %v335_v39 = vld [vmem:[#allocation5 + $0x1e8] sm:$0xff]  ;;  %v240_v40 = vld [vmem:[#allocation5 + $0x160] sm:$0xff] }
  0x1b   :  { %2822 = vmatprep.subr.mxu1 %v143_v13  ;;  %2788 = vmatpush3.msra.mxu0 %v49_v12  ;;  %v334_v41 = vld [vmem:[#allocation5 + $0x1e0] sm:$0xff]  ;;  %v239_v42 = vld [vmem:[#allocation5 + $0x158] sm:$0xff]  ;;  %v238_v44 = vld [vmem:[#allocation5 + $0x150] sm:$0xff] }
  0x1c   :  { %2823 = vmatpush3.msra.mxu1 %v143_v13  ;;  %2789 = vmatprep.subr.mxu0 %v48_v14  ;;  %v333_v43 = vld [vmem:[#allocation5 + $0x1d8] sm:$0xff]  ;;  %v332_v45 = vld [vmem:[#allocation5 + $0x1d0] sm:$0xff]  ;;  %v237_v46 = vld [vmem:[#allocation5 + $0x148] sm:$0xff] }
  0x1d   :  { %2824 = vmatprep.subr.mxu1 %v142_v15  ;;  %2790 = vmatpush3.msra.mxu0 %v48_v14  ;;  %v331_v47 = vld [vmem:[#allocation5 + $0x1c8] sm:$0xff]  ;;  %v236_v48 = vld [vmem:[#allocation5 + $0x140] sm:$0xff]  ;;  %v235_v50 = vld [vmem:[#allocation5 + $0x138] sm:$0xff] }
  0x1e   :  { %2825 = vmatpush3.msra.mxu1 %v142_v15  ;;  %2791 = vmatprep.subr.mxu0 %v47_v16  ;;  %v330_v49 = vld [vmem:[#allocation5 + $0x1c0] sm:$0xff]  ;;  %v329_v51 = vld [vmem:[#allocation5 + $0x1b8] sm:$0xff]  ;;  %v234_v52 = vld [vmem:[#allocation5 + $0x130] sm:$0xff] }
  0x1f   :  { %2826 = vmatprep.subr.mxu1 %v141_v17  ;;  %2792 = vmatpush3.msra.mxu0 %v47_v16  ;;  %v328_v53 = vld [vmem:[#allocation5 + $0x1b0] sm:$0xff]  ;;  %v233_v54 = vld [vmem:[#allocation5 + $0x128] sm:$0xff]  ;;  %v232_v56 = vld [vmem:[#allocation5 + $0x120] sm:$0xff] }
  0x20   :  { %2827 = vmatpush3.msra.mxu1 %v141_v17  ;;  %2793 = vmatprep.subr.mxu0 %v46_v18  ;;  %v327_v55 = vld [vmem:[#allocation5 + $0x1a8] sm:$0xff]  ;;  %v326_v57 = vld [vmem:[#allocation5 + $0x1a0] sm:$0xff]  ;;  %v231_v58 = vld [vmem:[#allocation5 + $0x118] sm:$0xff] }
  0x21   :  { %2828 = vmatprep.subr.mxu1 %v140_v19  ;;  %2794 = vmatpush3.msra.mxu0 %v46_v18  ;;  %v325_v59 = vld [vmem:[#allocation5 + $0x198] sm:$0xff]  ;;  %v230_v60 = vld [vmem:[#allocation5 + $0x110] sm:$0xff]  ;;  %v229_v62 = vld [vmem:[#allocation5 + $0x108] sm:$0xff] }
  0x22   :  { %2829 = vmatpush3.msra.mxu1 %v140_v19  ;;  %2795 = vmatprep.subr.mxu0 %v45_v20  ;;  %v324_v61 = vld [vmem:[#allocation5 + $0x190] sm:$0xff]  ;;  %v323_v63 = vld [vmem:[#allocation5 + $0x188] sm:$0xff]  ;;  %v228_v0 = vld [vmem:[#allocation5 + $0x100] sm:$0xff] }
  0x23   :  { %2830 = vmatprep.subr.mxu1 %v139_v21  ;;  %2796 = vmatpush3.msra.mxu0 %v45_v20  ;;  %v322_v1 = vld [vmem:[#allocation5 + $0x180] sm:$0xff]  ;;  %v431_v2 = vld [vmem:[#allocation5 + $0x278] sm:$0xff]  ;;  %v430_v4 = vld [vmem:[#allocation5 + $0x270] sm:$0xff] }
  0x24   :  { %2831 = vmatpush3.msra.mxu1 %v139_v21  ;;  %2797 = vmatprep.subr.mxu0 %v44_v22  ;;  %v525_v3 = vld [vmem:[#allocation5 + $0x2f8] sm:$0xff]  ;;  %v524_v5 = vld [vmem:[#allocation5 + $0x2f0] sm:$0xff]  ;;  %v429_v6 = vld [vmem:[#allocation5 + $0x268] sm:$0xff] }
  0x25   :  { %2832 = vmatprep.subr.mxu1 %v138_v23  ;;  %2798 = vmatpush3.msra.mxu0 %v44_v22  ;;  %v523_v7 = vld [vmem:[#allocation5 + $0x2e8] sm:$0xff]  ;;  %v428_v8 = vld [vmem:[#allocation5 + $0x260] sm:$0xff]  ;;  %v427_v10 = vld [vmem:[#allocation5 + $0x258] sm:$0xff] }
  0x26   :  { %2833 = vmatpush3.msra.mxu1 %v138_v23  ;;  %2799 = vmatprep.subr.mxu0 %v43_v24  ;;  %v522_v9 = vld [vmem:[#allocation5 + $0x2e0] sm:$0xff]  ;;  %v521_v11 = vld [vmem:[#allocation5 + $0x2d8] sm:$0xff]  ;;  %v426_v12 = vld [vmem:[#allocation5 + $0x250] sm:$0xff] }
  0x27   :  { %2834 = vmatprep.subr.mxu1 %v137_v25  ;;  %2800 = vmatpush3.msra.mxu0 %v43_v24  ;;  %v520_v13 = vld [vmem:[#allocation5 + $0x2d0] sm:$0xff]  ;;  %v425_v14 = vld [vmem:[#allocation5 + $0x248] sm:$0xff]  ;;  %v424_v16 = vld [vmem:[#allocation5 + $0x240] sm:$0xff] }
  0x28   :  { %2835 = vmatpush3.msra.mxu1 %v137_v25  ;;  %2801 = vmatprep.subr.mxu0 %v42_v26  ;;  %v519_v15 = vld [vmem:[#allocation5 + $0x2c8] sm:$0xff]  ;;  %v518_v17 = vld [vmem:[#allocation5 + $0x2c0] sm:$0xff]  ;;  %v423_v18 = vld [vmem:[#allocation5 + $0x238] sm:$0xff] }
  0x29   :  { %2836 = vmatprep.subr.mxu1 %v136_v27  ;;  %2802 = vmatpush3.msra.mxu0 %v42_v26  ;;  %v517_v19 = vld [vmem:[#allocation5 + $0x2b8] sm:$0xff]  ;;  %v422_v20 = vld [vmem:[#allocation5 + $0x230] sm:$0xff]  ;;  %v421_v22 = vld [vmem:[#allocation5 + $0x228] sm:$0xff] }
  0x2a   :  { %2837 = vmatpush3.msra.mxu1 %v136_v27  ;;  %2803 = vmatprep.subr.mxu0 %v41_v28  ;;  %v516_v21 = vld [vmem:[#allocation5 + $0x2b0] sm:$0xff]  ;;  %v515_v23 = vld [vmem:[#allocation5 + $0x2a8] sm:$0xff]  ;;  %v420_v24 = vld [vmem:[#allocation5 + $0x220] sm:$0xff] }
  0x2b   :  { %2838 = vmatprep.subr.mxu1 %v135_v29  ;;  %2804 = vmatpush3.msra.mxu0 %v41_v28  ;;  %v514_v25 = vld [vmem:[#allocation5 + $0x2a0] sm:$0xff]  ;;  %v419_v26 = vld [vmem:[#allocation5 + $0x218] sm:$0xff]  ;;  %v418_v28 = vld [vmem:[#allocation5 + $0x210] sm:$0xff] }
  0x2c   :  { %2839 = vmatpush3.msra.mxu1 %v135_v29  ;;  %2805 = vmatprep.subr.mxu0 %v40_v30  ;;  %v513_v27 = vld [vmem:[#allocation5 + $0x298] sm:$0xff]  ;;  %v512_v29 = vld [vmem:[#allocation5 + $0x290] sm:$0xff] }
  0x2d   :  { %2840 = vmatprep.subr.mxu1 %v134_v31  ;;  %2806 = vmatpush3.msra.mxu0 %v40_v30  ;;  %v417_v30 = vld [vmem:[#allocation5 + $0x208] sm:$0xff] }
  0x2e   :  { %2807 = vmatprep.mubr.f32.mxu0 %v3630_v32  ;;  %2841 = vmatpush3.msra.mxu1 %v134_v31  ;;  %v511_v31 = vld [vmem:[#allocation5 + $0x288] sm:$0xff] }
  0x2f   :  { %2842 = vmatprep.mubr.f32.mxu1 %v3630_v32  ;;  %2808 = vmatmul.mubr.f32.vlgmr.msra.gmra.mxu0 %v3635_v33 }
  0x30   :  { %2843 = vmatmul.mubr.f32.vlgmr.msra.gmra.mxu1 %v3635_v33  ;;  %2845 = vmatprep.subr.mxu0 %v243_v34 }
  0x31   :  { %2880 = vmatprep.subr.mxu1 %v337_v35  ;;  %2846 = vmatpush3.msra.mxu0 %v243_v34  ;;  %v416_v34 = vld [vmem:[#allocation5 + $0x200] sm:$0xff] }
  0x32   :  { %2881 = vmatpush3.msra.mxu1 %v337_v35  ;;  %2847 = vmatprep.subr.mxu0 %v242_v36  ;;  %v510_v35 = vld [vmem:[#allocation5 + $0x280] sm:$0xff] }
  0x33   :  { %2882 = vmatprep.subr.mxu1 %v336_v37  ;;  %2848 = vmatpush3.msra.mxu0 %v242_v36  ;;  %v619_v36 = vld [vmem:[#allocation5 + $0x378] sm:$0xff] }
  0x34   :  { %2883 = vmatpush3.msra.mxu1 %v336_v37  ;;  %2849 = vmatprep.subr.mxu0 %v241_v38  ;;  %v713_v37 = vld [vmem:[#allocation5 + $0x3f8] sm:$0xff] }
  0x35   :  { %2884 = vmatprep.subr.mxu1 %v335_v39  ;;  %2850 = vmatpush3.msra.mxu0 %v241_v38  ;;  %v618_v38 = vld [vmem:[#allocation5 + $0x370] sm:$0xff] }
  0x36   :  { %2885 = vmatpush3.msra.mxu1 %v335_v39  ;;  %2851 = vmatprep.subr.mxu0 %v240_v40  ;;  %v712_v39 = vld [vmem:[#allocation5 + $0x3f0] sm:$0xff] }
  0x37   :  { %2886 = vmatprep.subr.mxu1 %v334_v41  ;;  %2852 = vmatpush3.msra.mxu0 %v240_v40  ;;  %v617_v40 = vld [vmem:[#allocation5 + $0x368] sm:$0xff] }
  0x38   :  { %2887 = vmatpush3.msra.mxu1 %v334_v41  ;;  %2853 = vmatprep.subr.mxu0 %v239_v42  ;;  %v711_v41 = vld [vmem:[#allocation5 + $0x3e8] sm:$0xff] }
  0x39   :  { %2888 = vmatprep.subr.mxu1 %v333_v43  ;;  %2854 = vmatpush3.msra.mxu0 %v239_v42  ;;  %v616_v42 = vld [vmem:[#allocation5 + $0x360] sm:$0xff] }
  0x3a   :  { %2889 = vmatpush3.msra.mxu1 %v333_v43  ;;  %2855 = vmatprep.subr.mxu0 %v238_v44  ;;  %v710_v43 = vld [vmem:[#allocation5 + $0x3e0] sm:$0xff] }
  0x3b   :  { %2890 = vmatprep.subr.mxu1 %v332_v45  ;;  %2856 = vmatpush3.msra.mxu0 %v238_v44  ;;  %v615_v44 = vld [vmem:[#allocation5 + $0x358] sm:$0xff] }
  0x3c   :  { %2891 = vmatpush3.msra.mxu1 %v332_v45  ;;  %2857 = vmatprep.subr.mxu0 %v237_v46  ;;  %v709_v45 = vld [vmem:[#allocation5 + $0x3d8] sm:$0xff] }
  0x3d   :  { %2892 = vmatprep.subr.mxu1 %v331_v47  ;;  %2858 = vmatpush3.msra.mxu0 %v237_v46  ;;  %v614_v46 = vld [vmem:[#allocation5 + $0x350] sm:$0xff] }
  0x3e   :  { %2893 = vmatpush3.msra.mxu1 %v331_v47  ;;  %2859 = vmatprep.subr.mxu0 %v236_v48  ;;  %v708_v47 = vld [vmem:[#allocation5 + $0x3d0] sm:$0xff] }
  0x3f   :  { %2894 = vmatprep.subr.mxu1 %v330_v49  ;;  %2860 = vmatpush3.msra.mxu0 %v236_v48  ;;  %v613_v48 = vld [vmem:[#allocation5 + $0x348] sm:$0xff] }
  0x40   :  { %2895 = vmatpush3.msra.mxu1 %v330_v49  ;;  %2861 = vmatprep.subr.mxu0 %v235_v50  ;;  %v707_v49 = vld [vmem:[#allocation5 + $0x3c8] sm:$0xff] }
  0x41   :  { %2896 = vmatprep.subr.mxu1 %v329_v51  ;;  %2862 = vmatpush3.msra.mxu0 %v235_v50  ;;  %v612_v50 = vld [vmem:[#allocation5 + $0x340] sm:$0xff] }
  0x42   :  { %2897 = vmatpush3.msra.mxu1 %v329_v51  ;;  %2863 = vmatprep.subr.mxu0 %v234_v52  ;;  %v706_v51 = vld [vmem:[#allocation5 + $0x3c0] sm:$0xff] }
  0x43   :  { %2898 = vmatprep.subr.mxu1 %v328_v53  ;;  %2864 = vmatpush3.msra.mxu0 %v234_v52  ;;  %v611_v52 = vld [vmem:[#allocation5 + $0x338] sm:$0xff] }
  0x44   :  { %2899 = vmatpush3.msra.mxu1 %v328_v53  ;;  %2865 = vmatprep.subr.mxu0 %v233_v54  ;;  %v705_v53 = vld [vmem:[#allocation5 + $0x3b8] sm:$0xff] }
  0x45   :  { %2900 = vmatprep.subr.mxu1 %v327_v55  ;;  %2866 = vmatpush3.msra.mxu0 %v233_v54  ;;  %v610_v54 = vld [vmem:[#allocation5 + $0x330] sm:$0xff] }
  0x46   :  { %2901 = vmatpush3.msra.mxu1 %v327_v55  ;;  %2867 = vmatprep.subr.mxu0 %v232_v56  ;;  %v704_v55 = vld [vmem:[#allocation5 + $0x3b0] sm:$0xff] }
  0x47   :  { %2902 = vmatprep.subr.mxu1 %v326_v57  ;;  %2868 = vmatpush3.msra.mxu0 %v232_v56  ;;  %v609_v56 = vld [vmem:[#allocation5 + $0x328] sm:$0xff] }
  0x48   :  { %2903 = vmatpush3.msra.mxu1 %v326_v57  ;;  %2869 = vmatprep.subr.mxu0 %v231_v58  ;;  %v703_v57 = vld [vmem:[#allocation5 + $0x3a8] sm:$0xff] }
  0x49   :  { %2904 = vmatprep.subr.mxu1 %v325_v59  ;;  %2870 = vmatpush3.msra.mxu0 %v231_v58  ;;  %v608_v58 = vld [vmem:[#allocation5 + $0x320] sm:$0xff] }
  0x4a   :  { %2905 = vmatpush3.msra.mxu1 %v325_v59  ;;  %2871 = vmatprep.subr.mxu0 %v230_v60  ;;  %v702_v59 = vld [vmem:[#allocation5 + $0x3a0] sm:$0xff] }
  0x4b   :  { %2906 = vmatprep.subr.mxu1 %v324_v61  ;;  %2872 = vmatpush3.msra.mxu0 %v230_v60  ;;  %v607_v60 = vld [vmem:[#allocation5 + $0x318] sm:$0xff] }
  0x4c   :  { %2907 = vmatpush3.msra.mxu1 %v324_v61  ;;  %2873 = vmatprep.subr.mxu0 %v229_v62  ;;  %v701_v61 = vld [vmem:[#allocation5 + $0x398] sm:$0xff] }
  0x4d   :  { %2908 = vmatprep.subr.mxu1 %v323_v63  ;;  %2874 = vmatpush3.msra.mxu0 %v229_v62  ;;  %v606_v62 = vld [vmem:[#allocation5 + $0x310] sm:$0xff] }
  0x4e   :  { %2909 = vmatpush3.msra.mxu1 %v323_v63  ;;  %2875 = vmatprep.subr.mxu0 %v228_v0  ;;  %v700_v63 = vld [vmem:[#allocation5 + $0x390] sm:$0xff] }
  0x4f   :  { %2910 = vmatprep.subr.mxu1 %v322_v1  ;;  %2876 = vmatpush3.msra.mxu0 %v228_v0  ;;  %v605_v0 = vld [vmem:[#allocation5 + $0x308] sm:$0xff] }
  0x50   :  { %2877 = vmatprep.mubr.f32.mxu0 %v3630_v32  ;;  %2911 = vmatpush3.msra.mxu1 %v322_v1  ;;  %v699_v1 = vld [vmem:[#allocation5 + $0x388] sm:$0xff] }
  0x51   :  { %2912 = vmatprep.mubr.f32.mxu1 %v3630_v32  ;;  %2878 = vmatmul.mubr.f32.vlgmr.msra.gmra.mxu0 %v3635_v33 }
  0x52   :  { %2913 = vmatmul.mubr.f32.vlgmr.msra.gmra.mxu1 %v3635_v33  ;;  %2915 = vmatprep.subr.mxu0 %v431_v2 }
  0x53   :  { %2950 = vmatprep.subr.mxu1 %v525_v3  ;;  %2916 = vmatpush3.msra.mxu0 %v431_v2  ;;  %v604_v2 = vld [vmem:[#allocation5 + $0x300] sm:$0xff] }
  0x54   :  { %2951 = vmatpush3.msra.mxu1 %v525_v3  ;;  %2917 = vmatprep.subr.mxu0 %v430_v4  ;;  %v698_v3 = vld [vmem:[#allocation5 + $0x380] sm:$0xff] }
  0x55   :  { %2952 = vmatprep.subr.mxu1 %v524_v5  ;;  %2918 = vmatpush3.msra.mxu0 %v430_v4  ;;  %v807_v4 = vld [vmem:[#allocation5 + $0x478] sm:$0xff] }
  0x56   :  { %2953 = vmatpush3.msra.mxu1 %v524_v5  ;;  %2919 = vmatprep.subr.mxu0 %v429_v6  ;;  %v806_v5 = vld [vmem:[#allocation5 + $0x470] sm:$0xff] }
  0x57   :  { %2954 = vmatprep.subr.mxu1 %v523_v7  ;;  %2920 = vmatpush3.msra.mxu0 %v429_v6  ;;  %v805_v6 = vld [vmem:[#allocation5 + $0x468] sm:$0xff] }
  0x58   :  { %2955 = vmatpush3.msra.mxu1 %v523_v7  ;;  %2921 = vmatprep.subr.mxu0 %v428_v8  ;;  %v804_v7 = vld [vmem:[#allocation5 + $0x460] sm:$0xff] }
  0x59   :  { %2956 = vmatprep.subr.mxu1 %v522_v9  ;;  %2922 = vmatpush3.msra.mxu0 %v428_v8  ;;  %v803_v8 = vld [vmem:[#allocation5 + $0x458] sm:$0xff] }
  0x5a   :  { %2957 = vmatpush3.msra.mxu1 %v522_v9  ;;  %2923 = vmatprep.subr.mxu0 %v427_v10  ;;  %v802_v9 = vld [vmem:[#allocation5 + $0x450] sm:$0xff] }
  0x5b   :  { %2958 = vmatprep.subr.mxu1 %v521_v11  ;;  %2924 = vmatpush3.msra.mxu0 %v427_v10  ;;  %v801_v10 = vld [vmem:[#allocation5 + $0x448] sm:$0xff] }
  0x5c   :  { %2959 = vmatpush3.msra.mxu1 %v521_v11  ;;  %2925 = vmatprep.subr.mxu0 %v426_v12  ;;  %v800_v11 = vld [vmem:[#allocation5 + $0x440] sm:$0xff] }
  0x5d   :  { %2960 = vmatprep.subr.mxu1 %v520_v13  ;;  %2926 = vmatpush3.msra.mxu0 %v426_v12  ;;  %v798_v12 = vld [vmem:[#allocation5 + $0x430] sm:$0xff] }
  0x5e   :  { %2961 = vmatpush3.msra.mxu1 %v520_v13  ;;  %2927 = vmatprep.subr.mxu0 %v425_v14  ;;  %v797_v13 = vld [vmem:[#allocation5 + $0x428] sm:$0xff] }
  0x5f   :  { %2962 = vmatprep.subr.mxu1 %v519_v15  ;;  %2928 = vmatpush3.msra.mxu0 %v425_v14  ;;  %v796_v14 = vld [vmem:[#allocation5 + $0x420] sm:$0xff] }
  0x60   :  { %2963 = vmatpush3.msra.mxu1 %v519_v15  ;;  %2929 = vmatprep.subr.mxu0 %v424_v16  ;;  %v795_v15 = vld [vmem:[#allocation5 + $0x418] sm:$0xff] }
  0x61   :  { %2964 = vmatprep.subr.mxu1 %v518_v17  ;;  %2930 = vmatpush3.msra.mxu0 %v424_v16  ;;  %v794_v16 = vld [vmem:[#allocation5 + $0x410] sm:$0xff] }
  0x62   :  { %2965 = vmatpush3.msra.mxu1 %v518_v17  ;;  %2931 = vmatprep.subr.mxu0 %v423_v18  ;;  %v793_v17 = vld [vmem:[#allocation5 + $0x408] sm:$0xff] }
  0x63   :  { %2966 = vmatprep.subr.mxu1 %v517_v19  ;;  %2932 = vmatpush3.msra.mxu0 %v423_v18  ;;  %v792_v18 = vld [vmem:[#allocation5 + $0x400] sm:$0xff] }
  0x64   :  { %2967 = vmatpush3.msra.mxu1 %v517_v19  ;;  %2933 = vmatprep.subr.mxu0 %v422_v20  ;;  %v3587_v19 = vmov 0.0  }
  0x65   :  { %2968 = vmatprep.subr.mxu1 %v516_v21  ;;  %2934 = vmatpush3.msra.mxu0 %v422_v20  ;;  %v886_v20 = vld [vmem:[%s4074_s3 + $0x8] sm:$0xff] }
  0x66   :  { %2969 = vmatpush3.msra.mxu1 %v516_v21  ;;  %2935 = vmatprep.subr.mxu0 %v421_v22 }
  0x67   :  { %2970 = vmatprep.subr.mxu1 %v515_v23  ;;  %2936 = vmatpush3.msra.mxu0 %v421_v22 }
  0x68   :  { %2971 = vmatpush3.msra.mxu1 %v515_v23  ;;  %2937 = vmatprep.subr.mxu0 %v420_v24 }
  0x69   :  { %2972 = vmatprep.subr.mxu1 %v514_v25  ;;  %2938 = vmatpush3.msra.mxu0 %v420_v24 }
  0x6a   :  { %2973 = vmatpush3.msra.mxu1 %v514_v25  ;;  %2939 = vmatprep.subr.mxu0 %v419_v26 }
  0x6b   :  { %2974 = vmatprep.subr.mxu1 %v513_v27  ;;  %2940 = vmatpush3.msra.mxu0 %v419_v26 }
  0x6c   :  { %2975 = vmatpush3.msra.mxu1 %v513_v27  ;;  %2941 = vmatprep.subr.mxu0 %v418_v28 }
  0x6d   :  { %2976 = vmatprep.subr.mxu1 %v512_v29  ;;  %2942 = vmatpush3.msra.mxu0 %v418_v28 }
  0x6e   :  { %2977 = vmatpush3.msra.mxu1 %v512_v29  ;;  %2943 = vmatprep.subr.mxu0 %v417_v30 }
  0x6f   :  { %2978 = vmatprep.subr.mxu1 %v511_v31  ;;  %2944 = vmatpush3.msra.mxu0 %v417_v30 }
  0x70   :  { %2979 = vmatpush3.msra.mxu1 %v511_v31  ;;  %2945 = vmatprep.subr.mxu0 %v416_v34 }
  0x71   :  { %2980 = vmatprep.subr.mxu1 %v510_v35  ;;  %2946 = vmatpush3.msra.mxu0 %v416_v34 }
  0x72   :  { %2947 = vmatprep.mubr.f32.mxu0 %v3630_v32  ;;  %2981 = vmatpush3.msra.mxu1 %v510_v35 }
  0x73   :  { %2982 = vmatprep.mubr.f32.mxu1 %v3630_v32  ;;  %2948 = vmatmul.mubr.f32.vlgmr.msra.gmra.mxu0 %v3635_v33 }
  0x74   :  { %2983 = vmatmul.mubr.f32.vlgmr.msra.gmra.mxu1 %v3635_v33  ;;  %2985 = vmatprep.subr.mxu0 %v619_v36 }
  0x75   :  { %3020 = vmatprep.subr.mxu1 %v713_v37  ;;  %2986 = vmatpush3.msra.mxu0 %v619_v36 }
  0x76   :  { %3021 = vmatpush3.msra.mxu1 %v713_v37  ;;  %2987 = vmatprep.subr.mxu0 %v618_v38 }
  0x77   :  { %3022 = vmatprep.subr.mxu1 %v712_v39  ;;  %2988 = vmatpush3.msra.mxu0 %v618_v38 }
  0x78   :  { %3023 = vmatpush3.msra.mxu1 %v712_v39  ;;  %2989 = vmatprep.subr.mxu0 %v617_v40  ;;  %v885_v39 = vld [vmem:[%s4074_s3] sm:$0xff] }
  0x79   :  { %3024 = vmatprep.subr.mxu1 %v711_v41  ;;  %2990 = vmatpush3.msra.mxu0 %v617_v40 }
  0x7a   :  { %3025 = vmatpush3.msra.mxu1 %v711_v41  ;;  %2991 = vmatprep.subr.mxu0 %v616_v42  ;;  %v888_v41 = vld [vmem:[%s4074_s3 + $0x18] sm:$0xff] }
  0x7b   :  { %3026 = vmatprep.subr.mxu1 %v710_v43  ;;  %2992 = vmatpush3.msra.mxu0 %v616_v42  ;;  %v887_v42 = vld [vmem:[%s4074_s3 + $0x10] sm:$0xff] }
  0x7c   :  { %3027 = vmatpush3.msra.mxu1 %v710_v43  ;;  %2993 = vmatprep.subr.mxu0 %v615_v44  ;;  %v890_v43 = vld [vmem:[%s4074_s3 + $0x28] sm:$0xff] }
  0x7d   :  { %3028 = vmatprep.subr.mxu1 %v709_v45  ;;  %2994 = vmatpush3.msra.mxu0 %v615_v44  ;;  %v889_v44 = vld [vmem:[%s4074_s3 + $0x20] sm:$0xff] }
  0x7e   :  { %3029 = vmatpush3.msra.mxu1 %v709_v45  ;;  %2995 = vmatprep.subr.mxu0 %v614_v46 }
  0x7f   :  { %3030 = vmatprep.subr.mxu1 %v708_v47  ;;  %2996 = vmatpush3.msra.mxu0 %v614_v46 }
  0x80   :  { %3031 = vmatpush3.msra.mxu1 %v708_v47  ;;  %2997 = vmatprep.subr.mxu0 %v613_v48 }
  0x81   :  { %3032 = vmatprep.subr.mxu1 %v707_v49  ;;  %2998 = vmatpush3.msra.mxu0 %v613_v48 }
  0x82   :  { %3033 = vmatpush3.msra.mxu1 %v707_v49  ;;  %2999 = vmatprep.subr.mxu0 %v612_v50 }
  0x83   :  { %3034 = vmatprep.subr.mxu1 %v706_v51  ;;  %3000 = vmatpush3.msra.mxu0 %v612_v50 }
  0x84   :  { %3035 = vmatpush3.msra.mxu1 %v706_v51  ;;  %3001 = vmatprep.subr.mxu0 %v611_v52 }
  0x85   :  { %3036 = vmatprep.subr.mxu1 %v705_v53  ;;  %3002 = vmatpush3.msra.mxu0 %v611_v52 }
  0x86   :  { %3037 = vmatpush3.msra.mxu1 %v705_v53  ;;  %3003 = vmatprep.subr.mxu0 %v610_v54 }
  0x87   :  { %3038 = vmatprep.subr.mxu1 %v704_v55  ;;  %3004 = vmatpush3.msra.mxu0 %v610_v54 }
  0x88   :  { %3039 = vmatpush3.msra.mxu1 %v704_v55  ;;  %3005 = vmatprep.subr.mxu0 %v609_v56 }
  0x89   :  { %3040 = vmatprep.subr.mxu1 %v703_v57  ;;  %3006 = vmatpush3.msra.mxu0 %v609_v56 }
  0x8a   :  { %3041 = vmatpush3.msra.mxu1 %v703_v57  ;;  %3007 = vmatprep.subr.mxu0 %v608_v58 }
  0x8b   :  { %3042 = vmatprep.subr.mxu1 %v702_v59  ;;  %3008 = vmatpush3.msra.mxu0 %v608_v58 }
  0x8c   :  { %3043 = vmatpush3.msra.mxu1 %v702_v59  ;;  %3009 = vmatprep.subr.mxu0 %v607_v60 }
  0x8d   :  { %3044 = vmatprep.subr.mxu1 %v701_v61  ;;  %3010 = vmatpush3.msra.mxu0 %v607_v60 }
  0x8e   :  { %3045 = vmatpush3.msra.mxu1 %v701_v61  ;;  %3011 = vmatprep.subr.mxu0 %v606_v62 }
  0x8f   :  { %3046 = vmatprep.subr.mxu1 %v700_v63  ;;  %3012 = vmatpush3.msra.mxu0 %v606_v62 }
  0x90   :  { %3047 = vmatpush3.msra.mxu1 %v700_v63  ;;  %3013 = vmatprep.subr.mxu0 %v605_v0 }
  0x91   :  { %3048 = vmatprep.subr.mxu1 %v699_v1  ;;  %3014 = vmatpush3.msra.mxu0 %v605_v0 }
  0x92   :  { %3049 = vmatpush3.msra.mxu1 %v699_v1  ;;  %3015 = vmatprep.subr.mxu0 %v604_v2 }
  0x93   :  { %3050 = vmatprep.subr.mxu1 %v698_v3  ;;  %3016 = vmatpush3.msra.mxu0 %v604_v2 }
  0x94   :  { %3017 = vmatprep.mubr.f32.mxu0 %v3630_v32  ;;  %3051 = vmatpush3.msra.mxu1 %v698_v3 }
  0x95   :  { %3052 = vmatprep.mubr.f32.mxu1 %v3630_v32  ;;  %3018 = vmatmul.mubr.f32.vlgmr.msra.gmra.mxu0 %v3635_v33 }
  0x96   :  { %3053 = vmatmul.mubr.f32.vlgmr.msra.gmra.mxu1 %v3635_v33  ;;  %3055 = vmatprep.subr.mxu0 %v807_v4 }
  0x97   :  { %3087 = vmatprep.mubr.f32.mxu0 %v3630_v32  ;;  %3056 = vmatpush3.msra.mxu0 %v807_v4  ;;  %v799_v32 = vld [vmem:[#allocation5 + $0x438] sm:$0xff] }
  0x98   :  { %3057 = vmatprep.subr.mxu0 %v806_v5  ;;  %919 = vmatprep.subr.mxu1 %v3587_v19 }
  0x99   :  { %3058 = vmatpush3.msra.mxu0 %v806_v5  ;;  %2394 = vmatprep.mubr.msk.f32.mxu1 %vm909_vm0, %v886_v20 }
  0x9a   :  { %3059 = vmatprep.subr.mxu0 %v805_v6 }
  0x9b   :  { %3060 = vmatpush3.msra.mxu0 %v805_v6 }
  0x9c   :  { %3061 = vmatprep.subr.mxu0 %v804_v7 }
  0x9d   :  { %3062 = vmatpush3.msra.mxu0 %v804_v7 }
  0x9e   :  { %3063 = vmatprep.subr.mxu0 %v803_v8 }
  0x9f   :  { %3064 = vmatpush3.msra.mxu0 %v803_v8 }
  0xa0   :  { %3065 = vmatprep.subr.mxu0 %v802_v9 }
  0xa1   :  { %3066 = vmatpush3.msra.mxu0 %v802_v9 }
  0xa2   :  { %3067 = vmatprep.subr.mxu0 %v801_v10 }
  0xa3   :  { %3068 = vmatpush3.msra.mxu0 %v801_v10 }
  0xa4   :  { %3069 = vmatprep.subr.mxu0 %v800_v11 }
  0xa5   :  { %3070 = vmatpush3.msra.mxu0 %v800_v11 }
  0xa6   :  { %3071 = vmatprep.subr.mxu0 %v799_v32 }
  0xa7   :  { %3072 = vmatpush3.msra.mxu0 %v799_v32 }
  0xa8   :  { %3073 = vmatprep.subr.mxu0 %v798_v12 }
  0xa9   :  { %3074 = vmatpush3.msra.mxu0 %v798_v12 }
  0xaa   :  { %3075 = vmatprep.subr.mxu0 %v797_v13 }
  0xab   :  { %3076 = vmatpush3.msra.mxu0 %v797_v13 }
  0xac   :  { %3077 = vmatprep.subr.mxu0 %v796_v14 }
  0xad   :  { %3078 = vmatpush3.msra.mxu0 %v796_v14 }
  0xae   :  { %3079 = vmatprep.subr.mxu0 %v795_v15 }
  0xaf   :  { %3080 = vmatpush3.msra.mxu0 %v795_v15 }
  0xb0   :  { %3081 = vmatprep.subr.mxu0 %v794_v16 }
  0xb1   :  { %3082 = vmatpush3.msra.mxu0 %v794_v16 }
  0xb2   :  { %3083 = vmatprep.subr.mxu0 %v793_v17 }
  0xb3   :  { %3084 = vmatpush3.msra.mxu0 %v793_v17 }
  0xb4   :  { %3085 = vmatprep.subr.mxu0 %v792_v18 }
  0xb5   :  { %3086 = vmatpush3.msra.mxu0 %v792_v18  ;;  %v1016_v18 = vld [vmem:[%s4073_s2 + $0x78] sm:$0xff] }
  0xb6   :  { %3088 = vmatmul.mubr.f32.vlgmr.msra.gmra.mxu0 %v3635_v33  ;;  %3116 = vmatprep.subr.mxu0 %v3587_v19 }
  0xb7   :  { %3148 = vmatprep.mubr.msk.f32.mxu0 %vm3588_vm2, %v3587_v19 }
  0xef   :  { %v2809_v22 = vpop.f32.mrf.mxu0 }
  0xf0   :  { %v2844_v21 = vpop.f32.mrf.mxu1 }
  0xf1   :  { %v122_v24 = vpop.f32.mrf.mxu0 }
  0xf2   :  { %v216_v23 = vpop.f32.mrf.mxu1 }
 0x111   :  { %v2879_v26 = vpop.f32.mrf.mxu0 }
 0x112   :  { %v2914_v25 = vpop.f32.mrf.mxu1 }
 0x113   :  { %v310_v33 = vpop.f32.mrf.mxu0 }
 0x114   :  { %v404_v27 = vpop.f32.mrf.mxu1 }
 0x133   :  { %v2949_v29 = vpop.f32.mrf.mxu0 }
 0x134   :  { %v2984_v28 = vpop.f32.mrf.mxu1 }
 0x135   :  { %v498_v31 = vpop.f32.mrf.mxu0 }
 0x136   :  { %v592_v30 = vpop.f32.mrf.mxu1 }
 0x155   :  { %v3019_v35 = vpop.f32.mrf.mxu0 }
 0x156   :  { %v3054_v34 = vpop.f32.mrf.mxu1 }
 0x157   :  { %920 = vmatpush1.msra.mxu1 %v3054_v34  ;;  %v686_v37 = vpop.f32.mrf.mxu0  ;;  %v1010_v34 = vld [vmem:[%s4073_s2 + $0x48] sm:$0xff] }
 0x158   :  { %v780_v36 = vpop.f32.mrf.mxu1  ;;  %921 = vmatprep.subr.mxu1 %v3587_v19 }
 0x159   :  { %922 = vmatpush1.msra.mxu1 %v780_v36  ;;  %v1009_v36 = vld [vmem:[%s4073_s2 + $0x40] sm:$0xff] }
 0x15a   :  { %923 = vmatprep.subr.mxu1 %v3587_v19 }
 0x15b   :  { %924 = vmatpush1.msra.mxu1 %v3019_v35 }
 0x15c   :  { %925 = vmatprep.subr.mxu1 %v3587_v19 }
 0x15d   :  { %926 = vmatpush1.msra.mxu1 %v686_v37 }
 0x15e   :  { %927 = vmatprep.subr.mxu1 %v3587_v19 }
 0x15f   :  { %928 = vmatpush1.msra.mxu1 %v2984_v28  ;;  %v1012_v28 = vld [vmem:[%s4073_s2 + $0x58] sm:$0xff] }
 0x160   :  { %929 = vmatprep.subr.mxu1 %v3587_v19 }
 0x161   :  { %930 = vmatpush1.msra.mxu1 %v592_v30  ;;  %v1011_v30 = vld [vmem:[%s4073_s2 + $0x50] sm:$0xff] }
 0x162   :  { %931 = vmatprep.subr.mxu1 %v3587_v19 }
 0x163   :  { %932 = vmatpush1.msra.mxu1 %v2949_v29 }
 0x164   :  { %933 = vmatprep.subr.mxu1 %v3587_v19 }
 0x165   :  { %934 = vmatpush1.msra.mxu1 %v498_v31 }
 0x166   :  { %935 = vmatprep.subr.mxu1 %v3587_v19 }
 0x167   :  { %936 = vmatpush1.msra.mxu1 %v2914_v25  ;;  %v1014_v25 = vld [vmem:[%s4073_s2 + $0x68] sm:$0xff] }
 0x168   :  { %937 = vmatprep.subr.mxu1 %v3587_v19 }
 0x169   :  { %938 = vmatpush1.msra.mxu1 %v404_v27  ;;  %v1013_v27 = vld [vmem:[%s4073_s2 + $0x60] sm:$0xff] }
 0x16a   :  { %939 = vmatprep.subr.mxu1 %v3587_v19 }
 0x16b   :  { %940 = vmatpush1.msra.mxu1 %v2879_v26 }
 0x16c   :  { %941 = vmatprep.subr.mxu1 %v3587_v19 }
 0x16d   :  { %942 = vmatpush1.msra.mxu1 %v310_v33 }
 0x16e   :  { %943 = vmatprep.subr.mxu1 %v3587_v19 }
 0x16f   :  { %944 = vmatpush1.msra.mxu1 %v2844_v21  ;;  %v1015_v21 = vld [vmem:[%s4073_s2 + $0x70] sm:$0xff] }
 0x170   :  { %945 = vmatprep.subr.mxu1 %v3587_v19 }
 0x171   :  { %946 = vmatpush1.msra.mxu1 %v216_v23 }
 0x172   :  { %947 = vmatprep.subr.mxu1 %v3587_v19 }
 0x173   :  { %948 = vmatpush1.msra.mxu1 %v2809_v22 }
 0x174   :  { %949 = vmatprep.subr.mxu1 %v3587_v19 }
 0x175   :  { %950 = vmatpush1.msra.mxu1 %v122_v24 }
 0x176   :  { %979 = vmatprep.subr.mxu1 %v3587_v19  ;;  %v3089_v38 = vpop.f32.mrf.mxu0 }
 0x177   :  { %980 = vmatpush2.msra.mxu1 %v3089_v38  ;;  %v1008_v38 = vld [vmem:[%s4073_s2 + $0x38] sm:$0xff] }
 0x178   :  { %v874_v40 = vpop.f32.mrf.mxu0  ;;  %981 = vmatprep.subr.mxu1 %v3587_v19 }
 0x179   :  { %982 = vmatpush2.msra.mxu1 %v874_v40  ;;  %v1007_v40 = vld [vmem:[%s4073_s2 + $0x30] sm:$0xff] }
 0x17a   :  { %984 = vmatmul.mubr.f32.vlgmr.msra.gmra.mxu1 %v885_v39 }
 0x17b   :  { %2395 = vmatprep.mubr.msk.f32.mxu1 %vm909_vm0, %v888_v41 }
 0x17e   :  { %989 = vmatmul.mubr.f32.gmra.mxu1 %v887_v42  ;;  %v1006_v42 = vld [vmem:[%s4073_s2 + $0x28] sm:$0xff] }
 0x17f   :  { %2396 = vmatprep.mubr.msk.f32.mxu1 %vm909_vm0, %v890_v43 }
 0x182   :  { %994 = vmatmul.mubr.f32.gmra.mxu1 %v889_v44  ;;  %v1005_v44 = vld [vmem:[%s4073_s2 + $0x20] sm:$0xff] }
 0x23a   :  { %v985_v45 = vpop.f32.mrf.mxu1 }
 0x23b   :  { %3492 = vtanh.f32 %v985_v45 }
 0x23c   :  { %v987_v46 = vpop.f32.mrf.mxu1 }
 0x23d   :  { %v1004_v46 = vld [vmem:[%s4073_s2 + $0x18] sm:$0xff] }
 0x23e   :  { %v990_v47 = vpop.f32.mrf.mxu1 }
 0x23f   :  { %3494 = vtanh.f32 %v990_v47 }
 0x240   :  { %v992_v48 = vpop.f32.mrf.mxu1 }
 0x241   :  { %v1003_v48 = vld [vmem:[%s4073_s2 + $0x10] sm:$0xff] }
 0x242   :  { %v3696_v51 = vpop.f32.mrf.mxu1 }
 0x244   :  { %v997_v52 = vpop.f32.mrf.mxu1 }
 0x248   :  { %v3493_v49 = vpop.eup %3492 }
 0x249   :  { %1017 = vxpose.xlu0.b32.start.end [1/1] (short) %v3493_v49, 128 }
 0x24c   :  { %v3495_v50 = vpop.eup %3494 }
 0x24d   :  { %3090 = vmatprep.subr.mxu1 %v3495_v50 }
 0x24e   :  { %3091 = vmatpush3.msra.mxu1 %v3495_v50  ;;  %v1002_v50 = vld [vmem:[%s4073_s2 + $0x8] sm:$0xff] }
 0x24f   :  { %3151 = vmatprep.subr.mxu1 %v3587_v19 }
 0x2c5   :  { %v1033_v53 = vpop.trf.xlu0 }
 0x2c6   :  { %3092 = vmatprep.mubr.msk.f32.mxu1 %vm1049_vm1, %v1033_v53  ;;  %v1001_v53 = vld [vmem:[%s4073_s2] sm:$0xff] }
 0x2c9   :  { %v1034_v54 = vpop.trf.xlu0 }
 0x2ca   :  { %3093 = vmatmul.mubr.msk.f32.vlgmr.msra.gmra.mxu1 %vm1049_vm1, %v1034_v54 }
 0x2cd   :  { %v1035_v55 = vpop.trf.xlu0 }
 0x2ce   :  { %3095 = vmatprep.mubr.msk.f32.mxu1 %vm1049_vm1, %v1035_v55 }
 0x2d1   :  { %v1036_v56 = vpop.trf.xlu0 }
 0x2d2   :  { %3096 = vmatmul.mubr.msk.f32.gmra.mxu1 %vm1049_vm1, %v1036_v56 }
 0x2d5   :  { %v1037_v57 = vpop.trf.xlu0 }
 0x2d6   :  { %3098 = vmatprep.mubr.msk.f32.mxu1 %vm1049_vm1, %v1037_v57 }
 0x2d9   :  { %v1038_v58 = vpop.trf.xlu0 }
 0x2da   :  { %3099 = vmatmul.mubr.msk.f32.gmra.mxu1 %vm1049_vm1, %v1038_v58 }
 0x2dd   :  { %v1039_v59 = vpop.trf.xlu0 }
 0x2de   :  { %3101 = vmatprep.mubr.msk.f32.mxu1 %vm1049_vm1, %v1039_v59 }
 0x2e1   :  { %v1040_v60 = vpop.trf.xlu0 }
 0x2e2   :  { %3102 = vmatmul.mubr.msk.f32.gmra.mxu1 %vm1049_vm1, %v1040_v60 }
 0x2e5   :  { %v1041_v61 = vpop.trf.xlu0 }
 0x2e6   :  { %3104 = vmatprep.mubr.msk.f32.mxu1 %vm1049_vm1, %v1041_v61 }
 0x2e9   :  { %v1042_v62 = vpop.trf.xlu0 }
 0x2ea   :  { %3105 = vmatmul.mubr.msk.f32.gmra.mxu1 %vm1049_vm1, %v1042_v62 }
 0x2ed   :  { %v1043_v63 = vpop.trf.xlu0 }
 0x2ee   :  { %3107 = vmatprep.mubr.msk.f32.mxu1 %vm1049_vm1, %v1043_v63 }
 0x2f1   :  { %v1044_v0 = vpop.trf.xlu0 }
 0x2f2   :  { %3108 = vmatmul.mubr.msk.f32.gmra.mxu1 %vm1049_vm1, %v1044_v0 }
 0x2f5   :  { %v1045_v1 = vpop.trf.xlu0 }
 0x2f6   :  { %3110 = vmatprep.mubr.msk.f32.mxu1 %vm1049_vm1, %v1045_v1 }
 0x2f9   :  { %v1046_v2 = vpop.trf.xlu0 }
 0x2fa   :  { %3111 = vmatmul.mubr.msk.f32.gmra.mxu1 %vm1049_vm1, %v1046_v2 }
 0x2fd   :  { %v1047_v3 = vpop.trf.xlu0 }
 0x2fe   :  { %3113 = vmatprep.mubr.msk.f32.mxu1 %vm1049_vm1, %v1047_v3 }
 0x301   :  { %v1048_v4 = vpop.trf.xlu0 }
 0x302   :  { %3114 = vmatmul.mubr.msk.f32.gmra.mxu1 %vm1049_vm1, %v1048_v4 }
 0x303   :  { %3183 = vmatprep.mubr.msk.f32.mxu1 %vm3588_vm2, %v3587_v19 }
 0x38a   :  { %v3094_v5 = vpop.f32.mrf.mxu1 }
 0x38b   :  { %v3777_v52 = vadd.f32 %v3094_v5, %v1002_v50 }
 0x38c   :  { %v1164_v6 = vpop.f32.mrf.mxu1 }
 0x38d   :  { %v3783_v54 = vadd.f32 %v1164_v6, %v1001_v53 }
 0x392   :  { %v3097_v7 = vpop.f32.mrf.mxu1 }
 0x393   :  { %v3765_v47 = vadd.f32 %v3097_v7, %v1004_v46 }
 0x394   :  { %v1174_v8 = vpop.f32.mrf.mxu1 }
 0x395   :  { %v3771_v49 = vadd.f32 %v1174_v8, %v1003_v48 }
 0x39a   :  { %v3100_v9 = vpop.f32.mrf.mxu1 }
 0x39b   :  { %v3753_v43 = vadd.f32 %v3100_v9, %v1006_v42 }
 0x39c   :  { %v1184_v10 = vpop.f32.mrf.mxu1 }
 0x39d   :  { %v3759_v45 = vadd.f32 %v1184_v10, %v1005_v44 }
 0x3a2   :  { %v3103_v11 = vpop.f32.mrf.mxu1 }
 0x3a3   :  { %v3741_v39 = vadd.f32 %v3103_v11, %v1008_v38 }
 0x3a4   :  { %v1194_v32 = vpop.f32.mrf.mxu1 }
 0x3a5   :  { %v3747_v41 = vadd.f32 %v1194_v32, %v1007_v40 }
 0x3aa   :  { %v3106_v12 = vpop.f32.mrf.mxu1 }
 0x3ab   :  { %v1210_v35 = vadd.f32 %v3106_v12, %v1010_v34 }
 0x3ac   :  { %v1204_v13 = vpop.f32.mrf.mxu1 }
 0x3ad   :  { %v1205_v37 = vadd.f32 %v1204_v13, %v1009_v36 }
 0x3b2   :  { %v3109_v14 = vpop.f32.mrf.mxu1 }
 0x3b3   :  { %v1220_v29 = vadd.f32 %v3109_v14, %v1012_v28 }
 0x3b4   :  { %v1214_v15 = vpop.f32.mrf.mxu1 }
 0x3b5   :  { %v1215_v31 = vadd.f32 %v1214_v15, %v1011_v30 }
 0x3ba   :  { %v3112_v16 = vpop.f32.mrf.mxu1 }
 0x3bb   :  { %v1230_v26 = vadd.f32 %v3112_v16, %v1014_v25 }
 0x3bc   :  { %v1224_v17 = vpop.f32.mrf.mxu1 }
 0x3bd   :  { %v1225_v33 = vadd.f32 %v1224_v17, %v1013_v27 }
 0x3c2   :  { %v3115_v20 = vpop.f32.mrf.mxu1 }
 0x3c3   :  { %v1240_v22 = vadd.f32 %v3115_v20, %v1016_v18 }
 0x3c4   :  { %v1234_v23 = vpop.f32.mrf.mxu1 }
 0x3c5   :  { %v1235_v24 = vadd.f32 %v1234_v23, %v1015_v21  ;;  %1273 = vmax.xlane.f32.xlu0 %v1240_v22 }
 0x3c7   :  { %1271 = vmax.xlane.f32.xlu1 %v1235_v24 }
 0x3cb   :  { %1269 = vmax.xlane.f32.xlu1 %v1230_v26 }
 0x3cf   :  { %1267 = vmax.xlane.f32.xlu1 %v1225_v33 }
 0x3d3   :  { %1265 = vmax.xlane.f32.xlu1 %v1220_v29 }
 0x3d7   :  { %1263 = vmax.xlane.f32.xlu1 %v1215_v31 }
 0x3db   :  { %1261 = vmax.xlane.f32.xlu1 %v1210_v35 }
 0x3df   :  { %1259 = vmax.xlane.f32.xlu1 %v1205_v37 }
 0x3e3   :  { %1257 = vmax.xlane.f32.xlu1 %v3741_v39 }
 0x3e7   :  { %1255 = vmax.xlane.f32.xlu1 %v3747_v41 }
 0x3eb   :  { %1253 = vmax.xlane.f32.xlu1 %v3753_v43 }
 0x3ef   :  { %1251 = vmax.xlane.f32.xlu1 %v3759_v45 }
 0x3f3   :  { %1249 = vmax.xlane.f32.xlu1 %v3765_v47 }
 0x3f7   :  { %1247 = vmax.xlane.f32.xlu1 %v3771_v49 }
 0x3fb   :  { %1245 = vmax.xlane.f32.xlu1 %v3777_v52 }
 0x3ff   :  { %1243 = vmax.xlane.f32.xlu1 %v3783_v54 }
 0x44e   :  { %v1274_v55 = vpop.xlane.xlu0 %1273 }
 0x44f   :  { %v1290_v56 = vsub.f32 %v1240_v22, %v1274_v55 }
 0x450   :  { %v1272_v57 = vpop.xlane.xlu1 %1271 }
 0x451   :  { %v1321_v58 = vmul.f32 1.442695, %v1290_v56  ;;  %v1289_v59 = vsub.f32 %v1235_v24, %v1272_v57  ;;  %v1520_v57 = vld [vmem:[#allocation5 + $0x78] sm:$0xff] }
 0x452   :  { %3152 = vmatpush3.msra.mxu1 %v1520_v57 }
 0x453   :  { %3496 = vpow2.f32 %v1321_v58  ;;  %v1319_v60 = vmul.f32 1.442695, %v1289_v59  ;;  %3153 = vmatprep.subr.mxu1 %v3587_v19  ;;  %v1519_v58 = vld [vmem:[#allocation5 + $0x70] sm:$0xff]  ;;  %v1518_v59 = vld [vmem:[#allocation5 + $0x68] sm:$0xff] }
 0x454   :  { %v1270_v61 = vpop.xlane.xlu1 %1269  ;;  %3154 = vmatpush3.msra.mxu1 %v1519_v58 }
 0x455   :  { %v1288_v62 = vsub.f32 %v1230_v26, %v1270_v61  ;;  %3498 = vpow2.f32 %v1319_v60  ;;  %3155 = vmatprep.subr.mxu1 %v3587_v19  ;;  %v1517_v60 = vld [vmem:[#allocation5 + $0x60] sm:$0xff]  ;;  %v1516_v61 = vld [vmem:[#allocation5 + $0x58] sm:$0xff] }
 0x456   :  { %3156 = vmatpush3.msra.mxu1 %v1518_v59 }
 0x457   :  { %v1317_v63 = vmul.f32 1.442695, %v1288_v62  ;;  %3157 = vmatprep.subr.mxu1 %v3587_v19  ;;  %v1515_v62 = vld [vmem:[#allocation5 + $0x50] sm:$0xff] }
 0x458   :  { %v1268_v0 = vpop.xlane.xlu1 %1267  ;;  %3158 = vmatpush3.msra.mxu1 %v1517_v60 }
 0x459   :  { %v1287_v1 = vsub.f32 %v1225_v33, %v1268_v0  ;;  %3500 = vpow2.f32 %v1317_v63  ;;  %3159 = vmatprep.subr.mxu1 %v3587_v19  ;;  %v1514_v63 = vld [vmem:[#allocation5 + $0x48] sm:$0xff]  ;;  %v1513_v0 = vld [vmem:[#allocation5 + $0x40] sm:$0xff] }
 0x45a   :  { %3160 = vmatpush3.msra.mxu1 %v1516_v61 }
 0x45b   :  { %v1315_v2 = vmul.f32 1.442695, %v1287_v1  ;;  %3161 = vmatprep.subr.mxu1 %v3587_v19  ;;  %v1512_v1 = vld [vmem:[#allocation5 + $0x38] sm:$0xff] }
 0x45c   :  { %v1266_v3 = vpop.xlane.xlu1 %1265  ;;  %3162 = vmatpush3.msra.mxu1 %v1515_v62 }
 0x45d   :  { %v1286_v4 = vsub.f32 %v1220_v29, %v1266_v3  ;;  %3502 = vpow2.f32 %v1315_v2  ;;  %3163 = vmatprep.subr.mxu1 %v3587_v19  ;;  %v1511_v2 = vld [vmem:[#allocation5 + $0x30] sm:$0xff]  ;;  %v1510_v3 = vld [vmem:[#allocation5 + $0x28] sm:$0xff] }
 0x45e   :  { %3164 = vmatpush3.msra.mxu1 %v1514_v63 }
 0x45f   :  { %v1313_v5 = vmul.f32 1.442695, %v1286_v4  ;;  %3165 = vmatprep.subr.mxu1 %v3587_v19  ;;  %v1509_v4 = vld [vmem:[#allocation5 + $0x20] sm:$0xff] }
 0x460   :  { %v3786_v6 = vpop.eup %3496  ;;  %v1264_v7 = vpop.xlane.xlu1 %1263  ;;  %3166 = vmatpush3.msra.mxu1 %v1513_v0 }
 0x461   :  { %v1285_v8 = vsub.f32 %v1215_v31, %v1264_v7  ;;  %1353 = vadd.xlane.f32.xlu1 %v3786_v6  ;;  %3504 = vpow2.f32 %v1313_v5  ;;  %3167 = vmatprep.subr.mxu1 %v3587_v19  ;;  %v1508_v5 = vld [vmem:[#allocation5 + $0x18] sm:$0xff]  ;;  %v1507_v7 = vld [vmem:[#allocation5 + $0x10] sm:$0xff] }
 0x462   :  { %v3789_v10 = vpop.eup %3498  ;;  %3168 = vmatpush3.msra.mxu1 %v1512_v1 }
 0x463   :  { %v1311_v9 = vmul.f32 1.442695, %v1285_v8  ;;  %3169 = vmatprep.subr.mxu1 %v3587_v19  ;;  %v1506_v8 = vld [vmem:[#allocation5 + $0x8] sm:$0xff] }
 0x464   :  { %v1262_v11 = vpop.xlane.xlu1 %1261  ;;  %3170 = vmatpush3.msra.mxu1 %v1511_v2 }
 0x465   :  { %v1284_v32 = vsub.f32 %v1210_v35, %v1262_v11  ;;  %1351 = vadd.xlane.f32.xlu1 %v3789_v10  ;;  %3506 = vpow2.f32 %v1311_v9  ;;  %3171 = vmatprep.subr.mxu1 %v3587_v19  ;;  %v1505_v9 = vld [vmem:[#allocation5] sm:$0xff] }
 0x466   :  { %v3792_v13 = vpop.eup %3500  ;;  %3172 = vmatpush3.msra.mxu1 %v1510_v3 }
 0x467   :  { %v1309_v12 = vmul.f32 1.442695, %v1284_v32  ;;  %3173 = vmatprep.subr.mxu1 %v3587_v19 }
 0x468   :  { %v1260_v14 = vpop.xlane.xlu1 %1259  ;;  %3174 = vmatpush3.msra.mxu1 %v1509_v4 }
 0x469   :  { %v1283_v15 = vsub.f32 %v1205_v37, %v1260_v14  ;;  %1349 = vadd.xlane.f32.xlu1 %v3792_v13  ;;  %3508 = vpow2.f32 %v1309_v12  ;;  %3175 = vmatprep.subr.mxu1 %v3587_v19 }
 0x46a   :  { %v3795_v17 = vpop.eup %3502  ;;  %3176 = vmatpush3.msra.mxu1 %v1508_v5 }
 0x46b   :  { %v1307_v16 = vmul.f32 1.442695, %v1283_v15  ;;  %3177 = vmatprep.subr.mxu1 %v3587_v19 }
 0x46c   :  { %v1258_v18 = vpop.xlane.xlu1 %1257  ;;  %3178 = vmatpush3.msra.mxu1 %v1507_v7 }
 0x46d   :  { %v1282_v20 = vsub.f32 %v3741_v39, %v1258_v18  ;;  %1347 = vadd.xlane.f32.xlu1 %v3795_v17  ;;  %3510 = vpow2.f32 %v1307_v16  ;;  %3179 = vmatprep.subr.mxu1 %v3587_v19 }
 0x46e   :  { %v3799_v22 = vpop.eup %3504  ;;  %3180 = vmatpush3.msra.mxu1 %v1506_v8 }
 0x46f   :  { %v1305_v21 = vmul.f32 1.442695, %v1282_v20  ;;  %3181 = vmatprep.subr.mxu1 %v3587_v19 }
 0x470   :  { %v1256_v23 = vpop.xlane.xlu1 %1255  ;;  %3182 = vmatpush3.msra.mxu1 %v1505_v9 }
 0x471   :  { %v1281_v24 = vsub.f32 %v3747_v41, %v1256_v23  ;;  %1345 = vadd.xlane.f32.xlu1 %v3799_v22  ;;  %3512 = vpow2.f32 %v1305_v21  ;;  %3186 = vmatprep.subr.mxu1 %v3587_v19 }
 0x472   :  { %v3803_v26 = vpop.eup %3506 }
 0x473   :  { %v1303_v25 = vmul.f32 1.442695, %v1281_v24 }
 0x474   :  { %v1254_v27 = vpop.xlane.xlu1 %1253 }
 0x475   :  { %v1280_v33 = vsub.f32 %v3753_v43, %v1254_v27  ;;  %1343 = vadd.xlane.f32.xlu1 %v3803_v26  ;;  %3514 = vpow2.f32 %v1303_v25 }
 0x476   :  { %v3807_v29 = vpop.eup %3508 }
 0x477   :  { %v1301_v28 = vmul.f32 1.442695, %v1280_v33 }
 0x478   :  { %v1252_v30 = vpop.xlane.xlu1 %1251 }
 0x479   :  { %v1279_v31 = vsub.f32 %v3759_v45, %v1252_v30  ;;  %1341 = vadd.xlane.f32.xlu1 %v3807_v29  ;;  %3516 = vpow2.f32 %v1301_v28 }
 0x47a   :  { %v3811_v35 = vpop.eup %3510 }
 0x47b   :  { %v1299_v34 = vmul.f32 1.442695, %v1279_v31 }
 0x47c   :  { %v1250_v36 = vpop.xlane.xlu1 %1249 }
 0x47d   :  { %v1278_v37 = vsub.f32 %v3765_v47, %v1250_v36  ;;  %1339 = vadd.xlane.f32.xlu1 %v3811_v35  ;;  %3518 = vpow2.f32 %v1299_v34 }
 0x47e   :  { %v3815_v39 = vpop.eup %3512 }
 0x47f   :  { %v1297_v38 = vmul.f32 1.442695, %v1278_v37 }
 0x480   :  { %v1248_v40 = vpop.xlane.xlu1 %1247 }
 0x481   :  { %v1277_v41 = vsub.f32 %v3771_v49, %v1248_v40  ;;  %1337 = vadd.xlane.f32.xlu1 %v3815_v39  ;;  %3520 = vpow2.f32 %v1297_v38 }
 0x482   :  { %v3819_v43 = vpop.eup %3514 }
 0x483   :  { %v1295_v42 = vmul.f32 1.442695, %v1277_v41 }
 0x484   :  { %v1246_v44 = vpop.xlane.xlu1 %1245 }
 0x485   :  { %3522 = vpow2.f32 %v1295_v42  ;;  %v1276_v45 = vsub.f32 %v3777_v52, %v1246_v44  ;;  %1335 = vadd.xlane.f32.xlu1 %v3819_v43 }
 0x486   :  { %v3823_v47 = vpop.eup %3516 }
 0x487   :  { %v1293_v46 = vmul.f32 1.442695, %v1276_v45 }
 0x488   :  { %v1244_v48 = vpop.xlane.xlu1 %1243 }
 0x489   :  { %3524 = vpow2.f32 %v1293_v46  ;;  %v1275_v50 = vsub.f32 %v3783_v54, %v1244_v48  ;;  %1333 = vadd.xlane.f32.xlu1 %v3823_v47 }
 0x48a   :  { %v3827_v53 = vpop.eup %3518 }
 0x48b   :  { %v1291_v49 = vmul.f32 1.442695, %v1275_v50 }
 0x48d   :  { %3526 = vpow2.f32 %v1291_v49  ;;  %1331 = vadd.xlane.f32.xlu1 %v3827_v53 }
 0x48e   :  { %v3830_v55 = vpop.eup %3520 }
 0x491   :  { %1329 = vadd.xlane.f32.xlu1 %v3830_v55 }
 0x492   :  { %v3833_v52 = vpop.eup %3522 }
 0x493   :  { %1327 = vadd.xlane.f32.xlu0 %v3833_v52 }
 0x496   :  { %v3836_v56 = vpop.eup %3524 }
 0x497   :  { %1325 = vadd.xlane.f32.xlu1 %v3836_v56 }
 0x49a   :  { %v3839_v54 = vpop.eup %3526 }
 0x49b   :  { %1323 = vadd.xlane.f32.xlu0 %v3839_v54 }
 0x4ea   :  { %v1354_v11 = vpop.xlane.xlu1 %1353 }
 0x4eb   :  { %3528 = vrcp.f32 %v1354_v11 }
 0x4ee   :  { %v1352_v32 = vpop.xlane.xlu1 %1351 }
 0x4ef   :  { %3530 = vrcp.f32 %v1352_v32 }
 0x4f2   :  { %v1350_v12 = vpop.xlane.xlu1 %1349 }
 0x4f3   :  { %3532 = vrcp.f32 %v1350_v12 }
 0x4f6   :  { %v1348_v14 = vpop.xlane.xlu1 %1347 }
 0x4f7   :  { %3534 = vrcp.f32 %v1348_v14 }
 0x4f8   :  { %v3529_v15 = vpop.eup %3528 }
 0x4f9   :  { %v1386_v16 = vmul.f32 %v3529_v15, %v1354_v11 }
 0x4fa   :  { %v1346_v18 = vpop.xlane.xlu1 %1345 }
 0x4fb   :  { %v1402_v20 = vsub.f32 2.0, %v1386_v16  ;;  %3536 = vrcp.f32 %v1346_v18 }
 0x4fc   :  { %v3531_v21 = vpop.eup %3530 }
 0x4fd   :  { %v1418_v23 = vmul.f32 %v3529_v15, %v1402_v20  ;;  %v1385_v24 = vmul.f32 %v3531_v21, %v1352_v32 }
 0x4fe   :  { %v1344_v25 = vpop.xlane.xlu1 %1343 }
 0x4ff   :  { %v1434_v27 = vmul.f32 %v3786_v6, %v1418_v23  ;;  %v1401_v33 = vsub.f32 2.0, %v1385_v24  ;;  %3538 = vrcp.f32 %v1344_v25 }
 0x500   :  { %v3533_v28 = vpop.eup %3532 }
 0x501   :  { %v1417_v30 = vmul.f32 %v3531_v21, %v1401_v33  ;;  %v1384_v31 = vmul.f32 %v3533_v28, %v1350_v12  ;;  %3117 = vmatpush3.xpose.msra.mxu0 %v1434_v27 }
 0x502   :  { %v1342_v34 = vpop.xlane.xlu1 %1341  ;;  %3118 = vmatprep.subr.mxu0 %v3587_v19 }
 0x503   :  { %v1433_v36 = vmul.f32 %v3789_v10, %v1417_v30  ;;  %v1400_v37 = vsub.f32 2.0, %v1384_v31  ;;  %3540 = vrcp.f32 %v1342_v34 }
 0x504   :  { %v3535_v38 = vpop.eup %3534 }
 0x505   :  { %v1416_v40 = vmul.f32 %v3533_v28, %v1400_v37  ;;  %v1383_v41 = vmul.f32 %v3535_v38, %v1348_v14  ;;  %3119 = vmatpush3.xpose.msra.mxu0 %v1433_v36 }
 0x506   :  { %v1340_v42 = vpop.xlane.xlu1 %1339  ;;  %3120 = vmatprep.subr.mxu0 %v3587_v19 }
 0x507   :  { %v1432_v6 = vmul.f32 %v3792_v13, %v1416_v40  ;;  %v1399_v44 = vsub.f32 2.0, %v1383_v41  ;;  %3542 = vrcp.f32 %v1340_v42 }
 0x508   :  { %v3537_v45 = vpop.eup %3536 }
 0x509   :  { %v1415_v46 = vmul.f32 %v3535_v38, %v1399_v44  ;;  %v1382_v48 = vmul.f32 %v3537_v45, %v1346_v18  ;;  %3121 = vmatpush3.xpose.msra.mxu0 %v1432_v6 }
 0x50a   :  { %v1338_v50 = vpop.xlane.xlu1 %1337  ;;  %3122 = vmatprep.subr.mxu0 %v3587_v19 }
 0x50b   :  { %v1431_v10 = vmul.f32 %v3795_v17, %v1415_v46  ;;  %v1398_v49 = vsub.f32 2.0, %v1382_v48  ;;  %3544 = vrcp.f32 %v1338_v50 }
 0x50c   :  { %v3539_v57 = vpop.eup %3538 }
 0x50d   :  { %v1414_v58 = vmul.f32 %v3537_v45, %v1398_v49  ;;  %v1381_v59 = vmul.f32 %v3539_v57, %v1344_v25  ;;  %3123 = vmatpush3.xpose.msra.mxu0 %v1431_v10 }
 0x50e   :  { %v1336_v60 = vpop.xlane.xlu1 %1335  ;;  %3124 = vmatprep.subr.mxu0 %v3587_v19 }
 0x50f   :  { %v1430_v13 = vmul.f32 %v3799_v22, %v1414_v58  ;;  %v1397_v61 = vsub.f32 2.0, %v1381_v59  ;;  %3546 = vrcp.f32 %v1336_v60 }
 0x510   :  { %v3541_v62 = vpop.eup %3540 }
 0x511   :  { %v1413_v63 = vmul.f32 %v3539_v57, %v1397_v61  ;;  %v1380_v0 = vmul.f32 %v3541_v62, %v1342_v34  ;;  %3125 = vmatpush3.xpose.msra.mxu0 %v1430_v13  ;;  %v1694_v61 = vld [vmem:[#allocation5 + $0x178] sm:$0xff] }
 0x512   :  { %v1334_v1 = vpop.xlane.xlu1 %1333  ;;  %3126 = vmatprep.subr.mxu0 %v3587_v19 }
 0x513   :  { %v1429_v17 = vmul.f32 %v3803_v26, %v1413_v63  ;;  %v1396_v2 = vsub.f32 2.0, %v1380_v0  ;;  %3548 = vrcp.f32 %v1334_v1  ;;  %v1688_v63 = vld [vmem:[#allocation5 + $0x148] sm:$0xff]  ;;  %v1687_v0 = vld [vmem:[#allocation5 + $0x140] sm:$0xff] }
 0x514   :  { %v3543_v3 = vpop.eup %3542 }
 0x515   :  { %v1412_v4 = vmul.f32 %v3541_v62, %v1396_v2  ;;  %v1379_v5 = vmul.f32 %v3543_v3, %v1340_v42  ;;  %3127 = vmatpush3.xpose.msra.mxu0 %v1429_v17  ;;  %v1691_v62 = vld [vmem:[#allocation5 + $0x160] sm:$0xff]  ;;  %v1685_v17 = vld [vmem:[#allocation5 + $0x130] sm:$0xff]  ;;  %v1684_v2 = vld [vmem:[#allocation5 + $0x128] sm:$0xff] }
 0x516   :  { %v1332_v7 = vpop.xlane.xlu1 %1331  ;;  %3128 = vmatprep.subr.mxu0 %v3587_v19 }
 0x517   :  { %v1428_v22 = vmul.f32 %v3807_v29, %v1412_v4  ;;  %v1395_v8 = vsub.f32 2.0, %v1379_v5  ;;  %3550 = vrcp.f32 %v1332_v7  ;;  %v1682_v4 = vld [vmem:[#allocation5 + $0x118] sm:$0xff]  ;;  %v1681_v5 = vld [vmem:[#allocation5 + $0x110] sm:$0xff] }
 0x518   :  { %v3545_v9 = vpop.eup %3544 }
 0x519   :  { %v1411_v11 = vmul.f32 %v3543_v3, %v1395_v8  ;;  %v1378_v32 = vmul.f32 %v3545_v9, %v1338_v50  ;;  %3129 = vmatpush3.xpose.msra.mxu0 %v1428_v22  ;;  %v1683_v3 = vld [vmem:[#allocation5 + $0x120] sm:$0xff]  ;;  %v1607_v8 = vld [vmem:[#allocation5 + $0xf8] sm:$0xff] }
 0x51a   :  { %v1330_v12 = vpop.xlane.xlu1 %1329  ;;  %3130 = vmatprep.subr.mxu0 %v3587_v19  ;;  %v1679_v22 = vld [vmem:[#allocation5 + $0x100] sm:$0xff] }
 0x51b   :  { %v1427_v26 = vmul.f32 %v3811_v35, %v1411_v11  ;;  %v1394_v14 = vsub.f32 2.0, %v1378_v32  ;;  %3552 = vrcp.f32 %v1330_v12  ;;  %v1606_v32 = vld [vmem:[#allocation5 + $0xf0] sm:$0xff] }
 0x51c   :  { %v3547_v15 = vpop.eup %3546  ;;  %v1328_v16 = vpop.xlane.xlu0 %1327 }
 0x51d   :  { %v1410_v18 = vmul.f32 %v3545_v9, %v1394_v14  ;;  %v1377_v20 = vmul.f32 %v3547_v15, %v1336_v60  ;;  %3554 = vrcp.f32 %v1328_v16  ;;  %3131 = vmatpush3.xpose.msra.mxu0 %v1427_v26  ;;  %v1868_v9 = vld [vmem:[#allocation5 + $0x278] sm:$0xff]  ;;  %v1605_v14 = vld [vmem:[#allocation5 + $0xe8] sm:$0xff] }
 0x51e   :  { %3132 = vmatprep.subr.mxu0 %v3587_v19 }
 0x51f   :  { %v1426_v29 = vmul.f32 %v3815_v39, %v1410_v18  ;;  %v1393_v21 = vsub.f32 2.0, %v1377_v20  ;;  %v1865_v18 = vld [vmem:[#allocation5 + $0x260] sm:$0xff]  ;;  %v1603_v20 = vld [vmem:[#allocation5 + $0xd8] sm:$0xff] }
 0x520   :  { %v3549_v23 = vpop.eup %3548  ;;  %v1326_v24 = vpop.xlane.xlu1 %1325 }
 0x521   :  { %v1409_v25 = vmul.f32 %v3547_v15, %v1393_v21  ;;  %v1376_v27 = vmul.f32 %v3549_v23, %v1334_v1  ;;  %3556 = vrcp.f32 %v1326_v24  ;;  %3133 = vmatpush3.xpose.msra.mxu0 %v1426_v29  ;;  %v1686_v1 = vld [vmem:[#allocation5 + $0x138] sm:$0xff]  ;;  %v1866_v15 = vld [vmem:[#allocation5 + $0x268] sm:$0xff]  ;;  %v1602_v21 = vld [vmem:[#allocation5 + $0xd0] sm:$0xff] }
 0x522   :  { %3134 = vmatprep.subr.mxu0 %v3587_v19  ;;  %v1864_v29 = vld [vmem:[#allocation5 + $0x258] sm:$0xff] }
 0x523   :  { %v1425_v35 = vmul.f32 %v3819_v43, %v1409_v25  ;;  %v1392_v33 = vsub.f32 2.0, %v1376_v27  ;;  %v1862_v25 = vld [vmem:[#allocation5 + $0x248] sm:$0xff]  ;;  %v1600_v27 = vld [vmem:[#allocation5 + $0xc0] sm:$0xff] }
 0x524   :  { %v3551_v28 = vpop.eup %3550  ;;  %v1324_v30 = vpop.xlane.xlu0 %1323 }
 0x525   :  { %v1408_v31 = vmul.f32 %v3549_v23, %v1392_v33  ;;  %v1375_v34 = vmul.f32 %v3551_v28, %v1332_v7  ;;  %3558 = vrcp.f32 %v1324_v30  ;;  %3135 = vmatpush3.xpose.msra.mxu0 %v1425_v35  ;;  %v1680_v7 = vld [vmem:[#allocation5 + $0x108] sm:$0xff]  ;;  %v1863_v23 = vld [vmem:[#allocation5 + $0x250] sm:$0xff]  ;;  %v1861_v35 = vld [vmem:[#allocation5 + $0x240] sm:$0xff] }
 0x526   :  { %3136 = vmatprep.subr.mxu0 %v3587_v19  ;;  %v1599_v33 = vld [vmem:[#allocation5 + $0xb8] sm:$0xff] }
 0x527   :  { %v1424_v39 = vmul.f32 %v3823_v47, %v1408_v31  ;;  %v1391_v36 = vsub.f32 2.0, %v1375_v34  ;;  %v1859_v31 = vld [vmem:[#allocation5 + $0x230] sm:$0xff]  ;;  %v1597_v34 = vld [vmem:[#allocation5 + $0xa8] sm:$0xff] }
 0x528   :  { %v3553_v37 = vpop.eup %3552 }
 0x529   :  { %v1407_v38 = vmul.f32 %v3551_v28, %v1391_v36  ;;  %v1374_v40 = vmul.f32 %v3553_v37, %v1330_v12  ;;  %3137 = vmatpush3.xpose.msra.mxu0 %v1424_v39  ;;  %v1867_v12 = vld [vmem:[#allocation5 + $0x270] sm:$0xff]  ;;  %v1860_v28 = vld [vmem:[#allocation5 + $0x238] sm:$0xff]  ;;  %v1858_v39 = vld [vmem:[#allocation5 + $0x228] sm:$0xff] }
 0x52a   :  { %v3555_v41 = vpop.eup %3554  ;;  %3138 = vmatprep.subr.mxu0 %v3587_v19  ;;  %v1596_v36 = vld [vmem:[#allocation5 + $0xa0] sm:$0xff] }
 0x52b   :  { %v1423_v43 = vmul.f32 %v3827_v53, %v1407_v38  ;;  %v1390_v42 = vsub.f32 2.0, %v1374_v40  ;;  %v1373_v6 = vmul.f32 %v3555_v41, %v1328_v16  ;;  %v1604_v16 = vld [vmem:[#allocation5 + $0xe0] sm:$0xff]  ;;  %v1595_v38 = vld [vmem:[#allocation5 + $0x98] sm:$0xff] }
 0x52c   :  { %v1856_v40 = vld [vmem:[#allocation5 + $0x218] sm:$0xff] }
 0x52d   :  { %v1406_v44 = vmul.f32 %v3553_v37, %v1390_v42  ;;  %v1389_v45 = vsub.f32 2.0, %v1373_v6  ;;  %3139 = vmatpush3.xpose.msra.mxu0 %v1423_v43  ;;  %v1857_v37 = vld [vmem:[#allocation5 + $0x220] sm:$0xff]  ;;  %v1855_v43 = vld [vmem:[#allocation5 + $0x210] sm:$0xff]  ;;  %v1593_v42 = vld [vmem:[#allocation5 + $0x88] sm:$0xff] }
 0x52e   :  { %v3557_v46 = vpop.eup %3556  ;;  %3140 = vmatprep.subr.mxu0 %v3587_v19  ;;  %v1854_v6 = vld [vmem:[#allocation5 + $0x208] sm:$0xff] }
 0x52f   :  { %v1422_v47 = vmul.f32 %v3830_v55, %v1406_v44  ;;  %v1405_v48 = vmul.f32 %v3555_v41, %v1389_v45  ;;  %v1372_v50 = vmul.f32 %v3557_v46, %v1326_v24  ;;  %v1601_v24 = vld [vmem:[#allocation5 + $0xc8] sm:$0xff]  ;;  %v1594_v41 = vld [vmem:[#allocation5 + $0x90] sm:$0xff]  ;;  %v1592_v44 = vld [vmem:[#allocation5 + $0x80] sm:$0xff] }
 0x530   :  { %v1853_v45 = vld [vmem:[#allocation5 + $0x200] sm:$0xff] }
 0x531   :  { %v1388_v10 = vsub.f32 2.0, %v1372_v50  ;;  %3141 = vmatpush3.xpose.msra.mxu0 %v1422_v47  ;;  %v1421_v57 = vmul.f32 %v3833_v52, %v1405_v48  ;;  %v1693_v52 = vld [vmem:[#allocation5 + $0x170] sm:$0xff]  ;;  %v2042_v47 = vld [vmem:[#allocation5 + $0x378] sm:$0xff] }
 0x532   :  { %v3559_v49 = vpop.eup %3558  ;;  %3142 = vmatprep.subr.mxu0 %v3587_v19  ;;  %v1780_v48 = vld [vmem:[#allocation5 + $0x1f0] sm:$0xff] }
 0x533   :  { %v1404_v53 = vmul.f32 %v3557_v46, %v1388_v10  ;;  %v1371_v58 = vmul.f32 %v3559_v49, %v1324_v30  ;;  %v1598_v30 = vld [vmem:[#allocation5 + $0xb0] sm:$0xff]  ;;  %v1781_v46 = vld [vmem:[#allocation5 + $0x1f8] sm:$0xff]  ;;  %v1779_v10 = vld [vmem:[#allocation5 + $0x1e8] sm:$0xff] }
 0x534   :  { %v2041_v50 = vld [vmem:[#allocation5 + $0x370] sm:$0xff] }
 0x535   :  { %v1387_v59 = vsub.f32 2.0, %v1371_v58  ;;  %3143 = vmatpush3.xpose.msra.mxu0 %v1421_v57  ;;  %v1420_v60 = vmul.f32 %v3836_v56, %v1404_v53  ;;  %v1692_v56 = vld [vmem:[#allocation5 + $0x168] sm:$0xff]  ;;  %v1778_v57 = vld [vmem:[#allocation5 + $0x1e0] sm:$0xff]  ;;  %v1777_v58 = vld [vmem:[#allocation5 + $0x1d8] sm:$0xff] }
 0x536   :  { %3144 = vmatprep.subr.mxu0 %v3587_v19  ;;  %v2039_v53 = vld [vmem:[#allocation5 + $0x360] sm:$0xff] }
 0x537   :  { %v1403_v13 = vmul.f32 %v3559_v49, %v1387_v59  ;;  %v2040_v49 = vld [vmem:[#allocation5 + $0x368] sm:$0xff]  ;;  %v2038_v59 = vld [vmem:[#allocation5 + $0x358] sm:$0xff] }
 0x539   :  { %3145 = vmatpush3.xpose.msra.mxu0 %v1420_v60  ;;  %v1419_v55 = vmul.f32 %v3839_v54, %v1403_v13  ;;  %v1690_v54 = vld [vmem:[#allocation5 + $0x158] sm:$0xff]  ;;  %v1776_v60 = vld [vmem:[#allocation5 + $0x1d0] sm:$0xff] }
 0x53a   :  { %3146 = vmatprep.subr.mxu0 %v3587_v19  ;;  %v2037_v13 = vld [vmem:[#allocation5 + $0x350] sm:$0xff] }
 0x53d   :  { %3147 = vmatpush3.xpose.msra.mxu0 %v1419_v55  ;;  %v1775_v55 = vld [vmem:[#allocation5 + $0x1c8] sm:$0xff] }
 0x53e   :  { %3221 = vmatprep.subr.mxu0 %v3587_v19 }
 0x540   :  { %3149 = vmatmul.mubr.f32.vlgmr.msra.gmra.mxu0 %v3696_v51  ;;  %v1689_v51 = vld [vmem:[#allocation5 + $0x150] sm:$0xff] }
 0x541   :  { %3222 = vmatpush3.msra.mxu0 %v1694_v61  ;;  %3253 = vmatprep.mubr.msk.f32.mxu0 %vm3588_vm2, %v3587_v19  ;;  %v2036_v61 = vld [vmem:[#allocation5 + $0x348] sm:$0xff] }
 0x542   :  { %3223 = vmatprep.subr.mxu0 %v3587_v19 }
 0x543   :  { %3224 = vmatpush3.msra.mxu0 %v1693_v52  ;;  %v1774_v52 = vld [vmem:[#allocation5 + $0x1c0] sm:$0xff] }
 0x544   :  { %3225 = vmatprep.subr.mxu0 %v3587_v19 }
 0x545   :  { %3226 = vmatpush3.msra.mxu0 %v1692_v56  ;;  %v2035_v56 = vld [vmem:[#allocation5 + $0x340] sm:$0xff] }
 0x546   :  { %3227 = vmatprep.subr.mxu0 %v3587_v19 }
 0x547   :  { %3228 = vmatpush3.msra.mxu0 %v1691_v62  ;;  %v1773_v62 = vld [vmem:[#allocation5 + $0x1b8] sm:$0xff] }
 0x548   :  { %3229 = vmatprep.subr.mxu0 %v3587_v19 }
 0x549   :  { %3230 = vmatpush3.msra.mxu0 %v1690_v54  ;;  %v2034_v54 = vld [vmem:[#allocation5 + $0x338] sm:$0xff] }
 0x54a   :  { %3231 = vmatprep.subr.mxu0 %v3587_v19 }
 0x54b   :  { %3232 = vmatpush3.msra.mxu0 %v1689_v51  ;;  %v1772_v51 = vld [vmem:[#allocation5 + $0x1b0] sm:$0xff] }
 0x54c   :  { %3233 = vmatprep.subr.mxu0 %v3587_v19 }
 0x54d   :  { %3234 = vmatpush3.msra.mxu0 %v1688_v63  ;;  %v2033_v63 = vld [vmem:[#allocation5 + $0x330] sm:$0xff] }
 0x54e   :  { %3235 = vmatprep.subr.mxu0 %v3587_v19 }
 0x54f   :  { %3236 = vmatpush3.msra.mxu0 %v1687_v0  ;;  %v1771_v0 = vld [vmem:[#allocation5 + $0x1a8] sm:$0xff] }
 0x550   :  { %3237 = vmatprep.subr.mxu0 %v3587_v19 }
 0x551   :  { %3238 = vmatpush3.msra.mxu0 %v1686_v1  ;;  %v2032_v1 = vld [vmem:[#allocation5 + $0x328] sm:$0xff] }
 0x552   :  { %3239 = vmatprep.subr.mxu0 %v3587_v19 }
 0x553   :  { %3240 = vmatpush3.msra.mxu0 %v1685_v17  ;;  %v1770_v17 = vld [vmem:[#allocation5 + $0x1a0] sm:$0xff] }
 0x554   :  { %3241 = vmatprep.subr.mxu0 %v3587_v19 }
 0x555   :  { %3242 = vmatpush3.msra.mxu0 %v1684_v2  ;;  %v2031_v2 = vld [vmem:[#allocation5 + $0x320] sm:$0xff] }
 0x556   :  { %3243 = vmatprep.subr.mxu0 %v3587_v19 }
 0x557   :  { %3244 = vmatpush3.msra.mxu0 %v1683_v3  ;;  %v1769_v3 = vld [vmem:[#allocation5 + $0x198] sm:$0xff] }
 0x558   :  { %3245 = vmatprep.subr.mxu0 %v3587_v19 }
 0x559   :  { %3246 = vmatpush3.msra.mxu0 %v1682_v4  ;;  %v2030_v4 = vld [vmem:[#allocation5 + $0x318] sm:$0xff] }
 0x55a   :  { %3247 = vmatprep.subr.mxu0 %v3587_v19 }
 0x55b   :  { %3248 = vmatpush3.msra.mxu0 %v1681_v5  ;;  %v1768_v5 = vld [vmem:[#allocation5 + $0x190] sm:$0xff] }
 0x55c   :  { %3249 = vmatprep.subr.mxu0 %v3587_v19 }
 0x55d   :  { %3250 = vmatpush3.msra.mxu0 %v1680_v7  ;;  %v2029_v7 = vld [vmem:[#allocation5 + $0x310] sm:$0xff] }
 0x55e   :  { %3251 = vmatprep.subr.mxu0 %v3587_v19 }
 0x55f   :  { %3252 = vmatpush3.msra.mxu0 %v1679_v22  ;;  %v1767_v22 = vld [vmem:[#allocation5 + $0x188] sm:$0xff] }
 0x560   :  { %3291 = vmatprep.subr.mxu0 %v3587_v19 }
 0x600   :  { %v3913_v11 = vpop.f32.mrf.mxu0 }
 0x601   :  { %3184 = vmatmul.mubr.f32.vlgmr.msra.gmra.mxu1 %v3913_v11  ;;  %3254 = vmatmul.mubr.f32.vlgmr.msra.gmra.mxu0 %v3913_v11 }
 0x602   :  { %3187 = vmatpush3.msra.mxu1 %v1607_v8  ;;  %3292 = vmatpush3.msra.mxu0 %v1868_v9  ;;  %v3150_v26 = vpop.f32.mrf.mxu0  ;;  %v2028_v8 = vld [vmem:[#allocation5 + $0x308] sm:$0xff]  ;;  %v1766_v9 = vld [vmem:[#allocation5 + $0x180] sm:$0xff] }
 0x603   :  { %3188 = vmatprep.subr.mxu1 %v3587_v19  ;;  %3293 = vmatprep.subr.mxu0 %v3587_v19  ;;  %v2216_v26 = vld [vmem:[#allocation5 + $0x478] sm:$0xff] }
 0x604   :  { %3189 = vmatpush3.msra.mxu1 %v1606_v32  ;;  %3294 = vmatpush3.msra.mxu0 %v1867_v12  ;;  %v2027_v32 = vld [vmem:[#allocation5 + $0x300] sm:$0xff]  ;;  %v1955_v12 = vld [vmem:[#allocation5 + $0x2f8] sm:$0xff] }
 0x605   :  { %3190 = vmatprep.subr.mxu1 %v3587_v19  ;;  %3295 = vmatprep.subr.mxu0 %v3587_v19 }
 0x606   :  { %3191 = vmatpush3.msra.mxu1 %v1605_v14  ;;  %3296 = vmatpush3.msra.mxu0 %v1866_v15  ;;  %v1954_v14 = vld [vmem:[#allocation5 + $0x2f0] sm:$0xff] }
 0x607   :  { %3192 = vmatprep.subr.mxu1 %v3587_v19  ;;  %3297 = vmatprep.subr.mxu0 %v3587_v19  ;;  %v2215_v15 = vld [vmem:[#allocation5 + $0x470] sm:$0xff] }
 0x608   :  { %3193 = vmatpush3.msra.mxu1 %v1604_v16  ;;  %3298 = vmatpush3.msra.mxu0 %v1865_v18  ;;  %v1953_v16 = vld [vmem:[#allocation5 + $0x2e8] sm:$0xff] }
 0x609   :  { %3194 = vmatprep.subr.mxu1 %v3587_v19  ;;  %3299 = vmatprep.subr.mxu0 %v3587_v19  ;;  %v2214_v18 = vld [vmem:[#allocation5 + $0x468] sm:$0xff] }
 0x60a   :  { %3195 = vmatpush3.msra.mxu1 %v1603_v20  ;;  %3300 = vmatpush3.msra.mxu0 %v1864_v29  ;;  %v1952_v20 = vld [vmem:[#allocation5 + $0x2e0] sm:$0xff] }
 0x60b   :  { %3196 = vmatprep.subr.mxu1 %v3587_v19  ;;  %3301 = vmatprep.subr.mxu0 %v3587_v19  ;;  %v2213_v29 = vld [vmem:[#allocation5 + $0x460] sm:$0xff] }
 0x60c   :  { %3197 = vmatpush3.msra.mxu1 %v1602_v21  ;;  %3302 = vmatpush3.msra.mxu0 %v1863_v23  ;;  %v1951_v21 = vld [vmem:[#allocation5 + $0x2d8] sm:$0xff] }
 0x60d   :  { %3198 = vmatprep.subr.mxu1 %v3587_v19  ;;  %3303 = vmatprep.subr.mxu0 %v3587_v19  ;;  %v2212_v23 = vld [vmem:[#allocation5 + $0x458] sm:$0xff] }
 0x60e   :  { %3199 = vmatpush3.msra.mxu1 %v1601_v24  ;;  %3304 = vmatpush3.msra.mxu0 %v1862_v25  ;;  %v1950_v24 = vld [vmem:[#allocation5 + $0x2d0] sm:$0xff] }
 0x60f   :  { %3200 = vmatprep.subr.mxu1 %v3587_v19  ;;  %3305 = vmatprep.subr.mxu0 %v3587_v19  ;;  %v2211_v25 = vld [vmem:[#allocation5 + $0x450] sm:$0xff] }
 0x610   :  { %3201 = vmatpush3.msra.mxu1 %v1600_v27  ;;  %3306 = vmatpush3.msra.mxu0 %v1861_v35  ;;  %v1949_v27 = vld [vmem:[#allocation5 + $0x2c8] sm:$0xff] }
 0x611   :  { %3202 = vmatprep.subr.mxu1 %v3587_v19  ;;  %3307 = vmatprep.subr.mxu0 %v3587_v19  ;;  %v2210_v35 = vld [vmem:[#allocation5 + $0x448] sm:$0xff] }
 0x612   :  { %3203 = vmatpush3.msra.mxu1 %v1599_v33  ;;  %3308 = vmatpush3.msra.mxu0 %v1860_v28  ;;  %v1948_v33 = vld [vmem:[#allocation5 + $0x2c0] sm:$0xff] }
 0x613   :  { %3204 = vmatprep.subr.mxu1 %v3587_v19  ;;  %3309 = vmatprep.subr.mxu0 %v3587_v19  ;;  %v2209_v28 = vld [vmem:[#allocation5 + $0x440] sm:$0xff] }
 0x614   :  { %3205 = vmatpush3.msra.mxu1 %v1598_v30  ;;  %3310 = vmatpush3.msra.mxu0 %v1859_v31  ;;  %v1947_v30 = vld [vmem:[#allocation5 + $0x2b8] sm:$0xff] }
 0x615   :  { %3206 = vmatprep.subr.mxu1 %v3587_v19  ;;  %3311 = vmatprep.subr.mxu0 %v3587_v19  ;;  %v2208_v31 = vld [vmem:[#allocation5 + $0x438] sm:$0xff] }
 0x616   :  { %3207 = vmatpush3.msra.mxu1 %v1597_v34  ;;  %3312 = vmatpush3.msra.mxu0 %v1858_v39  ;;  %v1946_v34 = vld [vmem:[#allocation5 + $0x2b0] sm:$0xff] }
 0x617   :  { %3208 = vmatprep.subr.mxu1 %v3587_v19  ;;  %3313 = vmatprep.subr.mxu0 %v3587_v19  ;;  %v2207_v39 = vld [vmem:[#allocation5 + $0x430] sm:$0xff] }
 0x618   :  { %3209 = vmatpush3.msra.mxu1 %v1596_v36  ;;  %3314 = vmatpush3.msra.mxu0 %v1857_v37  ;;  %v1945_v36 = vld [vmem:[#allocation5 + $0x2a8] sm:$0xff] }
 0x619   :  { %3210 = vmatprep.subr.mxu1 %v3587_v19  ;;  %3315 = vmatprep.subr.mxu0 %v3587_v19  ;;  %v2206_v37 = vld [vmem:[#allocation5 + $0x428] sm:$0xff] }
 0x61a   :  { %3211 = vmatpush3.msra.mxu1 %v1595_v38  ;;  %3316 = vmatpush3.msra.mxu0 %v1856_v40  ;;  %v1944_v38 = vld [vmem:[#allocation5 + $0x2a0] sm:$0xff] }
 0x61b   :  { %3212 = vmatprep.subr.mxu1 %v3587_v19  ;;  %3317 = vmatprep.subr.mxu0 %v3587_v19  ;;  %v2205_v40 = vld [vmem:[#allocation5 + $0x420] sm:$0xff] }
 0x61c   :  { %3213 = vmatpush3.msra.mxu1 %v1594_v41  ;;  %3318 = vmatpush3.msra.mxu0 %v1855_v43  ;;  %v1943_v41 = vld [vmem:[#allocation5 + $0x298] sm:$0xff] }
 0x61d   :  { %3214 = vmatprep.subr.mxu1 %v3587_v19  ;;  %3319 = vmatprep.subr.mxu0 %v3587_v19  ;;  %v2204_v43 = vld [vmem:[#allocation5 + $0x418] sm:$0xff] }
 0x61e   :  { %3215 = vmatpush3.msra.mxu1 %v1593_v42  ;;  %3320 = vmatpush3.msra.mxu0 %v1854_v6  ;;  %v1942_v42 = vld [vmem:[#allocation5 + $0x290] sm:$0xff] }
 0x61f   :  { %3216 = vmatprep.subr.mxu1 %v3587_v19  ;;  %3321 = vmatprep.subr.mxu0 %v3587_v19  ;;  %v2203_v6 = vld [vmem:[#allocation5 + $0x410] sm:$0xff] }
 0x620   :  { %3217 = vmatpush3.msra.mxu1 %v1592_v44  ;;  %3218 = vmatprep.mubr.msk.f32.mxu1 %vm3588_vm2, %v3587_v19  ;;  %v1941_v44 = vld [vmem:[#allocation5 + $0x288] sm:$0xff] }
 0x621   :  { %3322 = vmatpush3.msra.mxu0 %v1853_v45  ;;  %3323 = vmatprep.mubr.msk.f32.mxu0 %vm3588_vm2, %v3587_v19  ;;  %v2202_v45 = vld [vmem:[#allocation5 + $0x408] sm:$0xff] }
 0x622   :  { %3219 = vmatmul.mubr.f32.vlgmr.msra.gmra.mxu1 %v3913_v11  ;;  %3256 = vmatprep.subr.mxu1 %v3587_v19 }
 0x623   :  { %3324 = vmatmul.mubr.f32.vlgmr.msra.gmra.mxu0 %v3913_v11  ;;  %3361 = vmatprep.subr.mxu0 %v3587_v19 }
 0x624   :  { %3257 = vmatpush3.msra.mxu1 %v1781_v46  ;;  %3362 = vmatpush3.msra.mxu0 %v2042_v47  ;;  %v1940_v46 = vld [vmem:[#allocation5 + $0x280] sm:$0xff] }
 0x625   :  { %3258 = vmatprep.subr.mxu1 %v3587_v19  ;;  %3363 = vmatprep.subr.mxu0 %v3587_v19  ;;  %v2201_v47 = vld [vmem:[#allocation5 + $0x400] sm:$0xff] }
 0x626   :  { %3259 = vmatpush3.msra.mxu1 %v1780_v48  ;;  %3364 = vmatpush3.msra.mxu0 %v2041_v50  ;;  %v2129_v48 = vld [vmem:[#allocation5 + $0x3f8] sm:$0xff]  ;;  %v2128_v50 = vld [vmem:[#allocation5 + $0x3f0] sm:$0xff] }
 0x627   :  { %3260 = vmatprep.subr.mxu1 %v3587_v19  ;;  %3365 = vmatprep.subr.mxu0 %v3587_v19 }
 0x628   :  { %3261 = vmatpush3.msra.mxu1 %v1779_v10  ;;  %3366 = vmatpush3.msra.mxu0 %v2040_v49  ;;  %v2127_v10 = vld [vmem:[#allocation5 + $0x3e8] sm:$0xff]  ;;  %v2126_v49 = vld [vmem:[#allocation5 + $0x3e0] sm:$0xff] }
 0x629   :  { %3262 = vmatprep.subr.mxu1 %v3587_v19  ;;  %3367 = vmatprep.subr.mxu0 %v3587_v19 }
 0x62a   :  { %3263 = vmatpush3.msra.mxu1 %v1778_v57  ;;  %3368 = vmatpush3.msra.mxu0 %v2039_v53  ;;  %v2125_v57 = vld [vmem:[#allocation5 + $0x3d8] sm:$0xff]  ;;  %v2124_v53 = vld [vmem:[#allocation5 + $0x3d0] sm:$0xff] }
 0x62b   :  { %3264 = vmatprep.subr.mxu1 %v3587_v19  ;;  %3369 = vmatprep.subr.mxu0 %v3587_v19 }
 0x62c   :  { %3265 = vmatpush3.msra.mxu1 %v1777_v58  ;;  %3370 = vmatpush3.msra.mxu0 %v2038_v59  ;;  %v2123_v58 = vld [vmem:[#allocation5 + $0x3c8] sm:$0xff]  ;;  %v2122_v59 = vld [vmem:[#allocation5 + $0x3c0] sm:$0xff] }
 0x62d   :  { %3266 = vmatprep.subr.mxu1 %v3587_v19  ;;  %3371 = vmatprep.subr.mxu0 %v3587_v19 }
 0x62e   :  { %3267 = vmatpush3.msra.mxu1 %v1776_v60  ;;  %3372 = vmatpush3.msra.mxu0 %v2037_v13  ;;  %v2121_v60 = vld [vmem:[#allocation5 + $0x3b8] sm:$0xff]  ;;  %v2120_v13 = vld [vmem:[#allocation5 + $0x3b0] sm:$0xff] }
 0x62f   :  { %3268 = vmatprep.subr.mxu1 %v3587_v19  ;;  %3373 = vmatprep.subr.mxu0 %v3587_v19 }
 0x630   :  { %3269 = vmatpush3.msra.mxu1 %v1775_v55  ;;  %3374 = vmatpush3.msra.mxu0 %v2036_v61  ;;  %v2119_v55 = vld [vmem:[#allocation5 + $0x3a8] sm:$0xff]  ;;  %v2118_v61 = vld [vmem:[#allocation5 + $0x3a0] sm:$0xff] }
 0x631   :  { %3270 = vmatprep.subr.mxu1 %v3587_v19  ;;  %3375 = vmatprep.subr.mxu0 %v3587_v19 }
 0x632   :  { %3271 = vmatpush3.msra.mxu1 %v1774_v52  ;;  %3376 = vmatpush3.msra.mxu0 %v2035_v56  ;;  %v2117_v52 = vld [vmem:[#allocation5 + $0x398] sm:$0xff]  ;;  %v2116_v56 = vld [vmem:[#allocation5 + $0x390] sm:$0xff] }
 0x633   :  { %3272 = vmatprep.subr.mxu1 %v3587_v19  ;;  %3377 = vmatprep.subr.mxu0 %v3587_v19 }
 0x634   :  { %3273 = vmatpush3.msra.mxu1 %v1773_v62  ;;  %3378 = vmatpush3.msra.mxu0 %v2034_v54  ;;  %v2115_v62 = vld [vmem:[#allocation5 + $0x388] sm:$0xff]  ;;  %v2114_v54 = vld [vmem:[#allocation5 + $0x380] sm:$0xff] }
 0x635   :  { %3274 = vmatprep.subr.mxu1 %v3587_v19  ;;  %3379 = vmatprep.subr.mxu0 %v3587_v19 }
 0x636   :  { %3275 = vmatpush3.msra.mxu1 %v1772_v51  ;;  %3380 = vmatpush3.msra.mxu0 %v2033_v63 }
 0x637   :  { %3276 = vmatprep.subr.mxu1 %v3587_v19  ;;  %3381 = vmatprep.subr.mxu0 %v3587_v19 }
 0x638   :  { %3277 = vmatpush3.msra.mxu1 %v1771_v0  ;;  %3382 = vmatpush3.msra.mxu0 %v2032_v1 }
 0x639   :  { %3278 = vmatprep.subr.mxu1 %v3587_v19  ;;  %3383 = vmatprep.subr.mxu0 %v3587_v19 }
 0x63a   :  { %3279 = vmatpush3.msra.mxu1 %v1770_v17  ;;  %3384 = vmatpush3.msra.mxu0 %v2031_v2  ;;  %v2288_v17 = vld [vmem:[%s4075_s4] sm:$0xff] }
 0x63b   :  { %3280 = vmatprep.subr.mxu1 %v3587_v19  ;;  %3385 = vmatprep.subr.mxu0 %v3587_v19 }
 0x63c   :  { %3281 = vmatpush3.msra.mxu1 %v1769_v3  ;;  %3386 = vmatpush3.msra.mxu0 %v2030_v4 }
 0x63d   :  { %3282 = vmatprep.subr.mxu1 %v3587_v19  ;;  %3387 = vmatprep.subr.mxu0 %v3587_v19 }
 0x63e   :  { %3283 = vmatpush3.msra.mxu1 %v1768_v5  ;;  %3388 = vmatpush3.msra.mxu0 %v2029_v7 }
 0x63f   :  { %3284 = vmatprep.subr.mxu1 %v3587_v19  ;;  %3389 = vmatprep.subr.mxu0 %v3587_v19 }
 0x640   :  { %3285 = vmatpush3.msra.mxu1 %v1767_v22  ;;  %3390 = vmatpush3.msra.mxu0 %v2028_v8 }
 0x641   :  { %3286 = vmatprep.subr.mxu1 %v3587_v19  ;;  %3391 = vmatprep.subr.mxu0 %v3587_v19 }
 0x642   :  { %3287 = vmatpush3.msra.mxu1 %v1766_v9  ;;  %3288 = vmatprep.mubr.msk.f32.mxu1 %vm3588_vm2, %v3587_v19 }
 0x643   :  { %3392 = vmatpush3.msra.mxu0 %v2027_v32  ;;  %3393 = vmatprep.mubr.msk.f32.mxu0 %vm3588_vm2, %v3587_v19 }
 0x644   :  { %3289 = vmatmul.mubr.f32.vlgmr.msra.gmra.mxu1 %v3913_v11  ;;  %3326 = vmatprep.subr.mxu1 %v3587_v19 }
 0x645   :  { %3394 = vmatmul.mubr.f32.vlgmr.msra.gmra.mxu0 %v3913_v11  ;;  %3431 = vmatprep.subr.mxu0 %v3587_v19 }
 0x646   :  { %3327 = vmatpush3.msra.mxu1 %v1955_v12  ;;  %3432 = vmatpush3.msra.mxu0 %v2216_v26 }
 0x647   :  { %3328 = vmatprep.subr.mxu1 %v3587_v19  ;;  %3433 = vmatprep.subr.mxu0 %v3587_v19 }
 0x648   :  { %3329 = vmatpush3.msra.mxu1 %v1954_v14  ;;  %3434 = vmatpush3.msra.mxu0 %v2215_v15  ;;  %v2289_v15 = vld [vmem:[%s4075_s4 + $0x8] sm:$0xff] }
 0x649   :  { %3330 = vmatprep.subr.mxu1 %v3587_v19  ;;  %3435 = vmatprep.subr.mxu0 %v3587_v19 }
 0x64a   :  { %3331 = vmatpush3.msra.mxu1 %v1953_v16  ;;  %3436 = vmatpush3.msra.mxu0 %v2214_v18  ;;  %v2382_v16 = vstv %s4076_s5 }
 0x64b   :  { %3332 = vmatprep.subr.mxu1 %v3587_v19  ;;  %3437 = vmatprep.subr.mxu0 %v3587_v19 }
 0x64c   :  { %3333 = vmatpush3.msra.mxu1 %v1952_v20  ;;  %3438 = vmatpush3.msra.mxu0 %v2213_v29 }
 0x64d   :  { %3334 = vmatprep.subr.mxu1 %v3587_v19  ;;  %3439 = vmatprep.subr.mxu0 %v3587_v19 }
 0x64e   :  { %3335 = vmatpush3.msra.mxu1 %v1951_v21  ;;  %3440 = vmatpush3.msra.mxu0 %v2212_v23  ;;  %v3560_v21 = vld [vmem:[%s4071_s0 + $0x8] sm:$0xff] }
 0x64f   :  { %3336 = vmatprep.subr.mxu1 %v3587_v19  ;;  %3441 = vmatprep.subr.mxu0 %v3587_v19 }
 0x650   :  { %3337 = vmatpush3.msra.mxu1 %v1950_v24  ;;  %3442 = vmatpush3.msra.mxu0 %v2211_v25 }
 0x651   :  { %3338 = vmatprep.subr.mxu1 %v3587_v19  ;;  %3443 = vmatprep.subr.mxu0 %v3587_v19 }
 0x652   :  { %3339 = vmatpush3.msra.mxu1 %v1949_v27  ;;  %3444 = vmatpush3.msra.mxu0 %v2210_v35 }
 0x653   :  { %3340 = vmatprep.subr.mxu1 %v3587_v19  ;;  %3445 = vmatprep.subr.mxu0 %v3587_v19 }
 0x654   :  { %3341 = vmatpush3.msra.mxu1 %v1948_v33  ;;  %3446 = vmatpush3.msra.mxu0 %v2209_v28 }
 0x655   :  { %3342 = vmatprep.subr.mxu1 %v3587_v19  ;;  %3447 = vmatprep.subr.mxu0 %v3587_v19 }
 0x656   :  { %3343 = vmatpush3.msra.mxu1 %v1947_v30  ;;  %3448 = vmatpush3.msra.mxu0 %v2208_v31 }
 0x657   :  { %3344 = vmatprep.subr.mxu1 %v3587_v19  ;;  %3449 = vmatprep.subr.mxu0 %v3587_v19 }
 0x658   :  { %3345 = vmatpush3.msra.mxu1 %v1946_v34  ;;  %3450 = vmatpush3.msra.mxu0 %v2207_v39 }
 0x659   :  { %3346 = vmatprep.subr.mxu1 %v3587_v19  ;;  %3451 = vmatprep.subr.mxu0 %v3587_v19 }
 0x65a   :  { %3347 = vmatpush3.msra.mxu1 %v1945_v36  ;;  %3452 = vmatpush3.msra.mxu0 %v2206_v37 }
 0x65b   :  { %3348 = vmatprep.subr.mxu1 %v3587_v19  ;;  %3453 = vmatprep.subr.mxu0 %v3587_v19 }
 0x65c   :  { %3349 = vmatpush3.msra.mxu1 %v1944_v38  ;;  %3454 = vmatpush3.msra.mxu0 %v2205_v40 }
 0x65d   :  { %3350 = vmatprep.subr.mxu1 %v3587_v19  ;;  %3455 = vmatprep.subr.mxu0 %v3587_v19 }
 0x65e   :  { %3351 = vmatpush3.msra.mxu1 %v1943_v41  ;;  %3456 = vmatpush3.msra.mxu0 %v2204_v43 }
 0x65f   :  { %3352 = vmatprep.subr.mxu1 %v3587_v19  ;;  %3457 = vmatprep.subr.mxu0 %v3587_v19 }
 0x660   :  { %3353 = vmatpush3.msra.mxu1 %v1942_v42  ;;  %3458 = vmatpush3.msra.mxu0 %v2203_v6 }
 0x661   :  { %3354 = vmatprep.subr.mxu1 %v3587_v19  ;;  %3459 = vmatprep.subr.mxu0 %v3587_v19 }
 0x662   :  { %3355 = vmatpush3.msra.mxu1 %v1941_v44  ;;  %3460 = vmatpush3.msra.mxu0 %v2202_v45 }
 0x663   :  { %3356 = vmatprep.subr.mxu1 %v3587_v19  ;;  %3461 = vmatprep.subr.mxu0 %v3587_v19 }
 0x664   :  { %3357 = vmatpush3.msra.mxu1 %v1940_v46  ;;  %3358 = vmatprep.mubr.msk.f32.mxu1 %vm3588_vm2, %v3587_v19 }
 0x665   :  { %3462 = vmatpush3.msra.mxu0 %v2201_v47  ;;  %3463 = vmatprep.mubr.msk.f32.mxu0 %vm3588_vm2, %v3587_v19 }
 0x666   :  { %3359 = vmatmul.mubr.f32.vlgmr.msra.gmra.mxu1 %v3913_v11  ;;  %3396 = vmatprep.subr.mxu1 %v3587_v19 }
 0x667   :  { %3464 = vmatmul.mubr.f32.vlgmr.msra.gmra.mxu0 %v3913_v11  ;;  %3397 = vmatpush3.msra.mxu1 %v2129_v48 }
 0x668   :  { %3398 = vmatprep.subr.mxu1 %v3587_v19  ;;  %3428 = vmatprep.mubr.msk.f32.mxu1 %vm3588_vm2, %v3587_v19 }
 0x669   :  { %3399 = vmatpush3.msra.mxu1 %v2128_v50 }
 0x66a   :  { %3400 = vmatprep.subr.mxu1 %v3587_v19 }
 0x66b   :  { %3401 = vmatpush3.msra.mxu1 %v2127_v10 }
 0x66c   :  { %3402 = vmatprep.subr.mxu1 %v3587_v19 }
 0x66d   :  { %3403 = vmatpush3.msra.mxu1 %v2126_v49 }
 0x66e   :  { %3404 = vmatprep.subr.mxu1 %v3587_v19 }
 0x66f   :  { %3405 = vmatpush3.msra.mxu1 %v2125_v57 }
 0x670   :  { %3406 = vmatprep.subr.mxu1 %v3587_v19 }
 0x671   :  { %3407 = vmatpush3.msra.mxu1 %v2124_v53 }
 0x672   :  { %3408 = vmatprep.subr.mxu1 %v3587_v19 }
 0x673   :  { %3409 = vmatpush3.msra.mxu1 %v2123_v58 }
 0x674   :  { %3410 = vmatprep.subr.mxu1 %v3587_v19 }
 0x675   :  { %3411 = vmatpush3.msra.mxu1 %v2122_v59 }
 0x676   :  { %3412 = vmatprep.subr.mxu1 %v3587_v19 }
 0x677   :  { %3413 = vmatpush3.msra.mxu1 %v2121_v60 }
 0x678   :  { %3414 = vmatprep.subr.mxu1 %v3587_v19 }
 0x679   :  { %3415 = vmatpush3.msra.mxu1 %v2120_v13 }
 0x67a   :  { %3416 = vmatprep.subr.mxu1 %v3587_v19 }
 0x67b   :  { %3417 = vmatpush3.msra.mxu1 %v2119_v55 }
 0x67c   :  { %3418 = vmatprep.subr.mxu1 %v3587_v19 }
 0x67d   :  { %3419 = vmatpush3.msra.mxu1 %v2118_v61 }
 0x67e   :  { %3420 = vmatprep.subr.mxu1 %v3587_v19 }
 0x67f   :  { %3421 = vmatpush3.msra.mxu1 %v2117_v52 }
 0x680   :  { %3422 = vmatprep.subr.mxu1 %v3587_v19 }
 0x681   :  { %3423 = vmatpush3.msra.mxu1 %v2116_v56 }
 0x682   :  { %3424 = vmatprep.subr.mxu1 %v3587_v19 }
 0x683   :  { %3425 = vmatpush3.msra.mxu1 %v2115_v62 }
 0x684   :  { %3426 = vmatprep.subr.mxu1 %v3587_v19 }
 0x685   :  { %3427 = vmatpush3.msra.mxu1 %v2114_v54 }
 0x686   :  { %3429 = vmatmul.mubr.f32.vlgmr.msra.gmra.mxu1 %v3913_v11 }
 0x687   :  { %3484 = vmatprep.mubr.msk.f32.mxu1 %vm2299_vm3, %v2288_v17 }
 0x6c1   :  { %v1587_v51 = vpop.f32.mrf.mxu1  ;;  %v1761_v63 = vpop.f32.mrf.mxu0 }
 0x6c3   :  { %v3185_v0 = vpop.f32.mrf.mxu1  ;;  %v3255_v1 = vpop.f32.mrf.mxu0 }
 0x6e2   :  { %v1674_v2 = vpop.f32.mrf.mxu1 }
 0x6e3   :  { %v1935_v3 = vpop.f32.mrf.mxu0 }
 0x6e4   :  { %v3220_v4 = vpop.f32.mrf.mxu1 }
 0x6e5   :  { %v3325_v5 = vpop.f32.mrf.mxu0 }
 0x704   :  { %v1848_v7 = vpop.f32.mrf.mxu1 }
 0x705   :  { %v2109_v19 = vpop.f32.mrf.mxu0 }
 0x706   :  { %v3290_v22 = vpop.f32.mrf.mxu1 }
 0x707   :  { %v3395_v8 = vpop.f32.mrf.mxu0 }
 0x726   :  { %v2022_v11 = vpop.f32.mrf.mxu1 }
 0x727   :  { %v2283_v9 = vpop.f32.mrf.mxu0 }
 0x728   :  { %3466 = vmatprep.subr.mxu1 %v2283_v9  ;;  %v3360_v32 = vpop.f32.mrf.mxu1 }
 0x729   :  { %v3465_v12 = vpop.f32.mrf.mxu0  ;;  %3467 = vmatpush3.msra.mxu1 %v2283_v9 }
 0x746   :  { %v2196_v26 = vpop.f32.mrf.mxu1 }
 0x747   :  { %3468 = vmatprep.subr.mxu1 %v2196_v26 }
 0x748   :  { %v3430_v14 = vpop.f32.mrf.mxu1  ;;  %3469 = vmatpush3.msra.mxu1 %v2196_v26 }
 0x749   :  { %3470 = vmatprep.subr.mxu1 %v2109_v19 }
 0x74a   :  { %3471 = vmatpush3.msra.mxu1 %v2109_v19 }
 0x74b   :  { %3472 = vmatprep.subr.mxu1 %v2022_v11 }
 0x74c   :  { %3473 = vmatpush3.msra.mxu1 %v2022_v11 }
 0x74d   :  { %3474 = vmatprep.subr.mxu1 %v1935_v3 }
 0x74e   :  { %3475 = vmatpush3.msra.mxu1 %v1935_v3 }
 0x74f   :  { %3476 = vmatprep.subr.mxu1 %v1848_v7 }
 0x750   :  { %3477 = vmatpush3.msra.mxu1 %v1848_v7 }
 0x751   :  { %3478 = vmatprep.subr.mxu1 %v1761_v63 }
 0x752   :  { %3479 = vmatpush3.msra.mxu1 %v1761_v63 }
 0x753   :  { %3480 = vmatprep.subr.mxu1 %v1674_v2 }
 0x754   :  { %3481 = vmatpush3.msra.mxu1 %v1674_v2 }
 0x755   :  { %3482 = vmatprep.subr.mxu1 %v1587_v51 }
 0x756   :  { %3483 = vmatpush3.msra.mxu1 %v1587_v51 }
 0x757   :  { %3485 = vmatmul.mubr.msk.f32.vlgmr.msra.gmra.mxu1 %vm2299_vm3, %v2289_v15 }
 0x817   :  { %v3486_v18 = vpop.f32.mrf.mxu1 }
 0x818   :  { %v2384_v20 = vmul.f32 %v3486_v18, %v2382_v16 }
 0x819   :  { %v2372_v29 = vpop.f32.mrf.mxu1 }
 0x81a   :  { %v2386_v23 = vadd.f32 %v3560_v21, %v2384_v20  ;;  %v2383_v24 = vmul.f32 %v2382_v16, %v2372_v29 }
 0x81c   :  { %2388 = vst [vmem:[%s4077_s6 + $0x8] sm:$0xff] %v2386_v23 }
 0x823   :  { %v3561_v25 = vld [vmem:[%s4071_s0] sm:$0xff] }
 0x824   :  { %v2385_v27 = vadd.f32 %v3561_v25, %v2383_v24 }
 0x826   :  { %2387 = vst [vmem:[%s4077_s6] sm:$0xff] %v2385_v27 }
 0x827   :  { %2393 = vsyncpa [#allocation6], 1 }

</bundles_post_ra>
